<compile_context>
chip_gen: v5e
topology: v5e:2x2
jax: 0.10.0
libtpu: 0.0.40
codegen_flags: <defaults>
</compile_context>

<pallas_src>
import functools

import jax
import jax.numpy as jnp
from jax import lax
from jax.experimental import pallas as pl
from jax.experimental.pallas import tpu as pltpu

P_DROP = 0.2
KEEP_SCALE = 1.0 / (1.0 - P_DROP)
# keep an element iff (hash >> 1) >= P_DROP * 2^31  (keep prob = 1 - P_DROP)
DROP_THRESHOLD_31 = int(P_DROP * (1 << 31))

IN_FEATURES = 784
IN_PAD = 896          # 7 * 128, lane-aligned K for the 784x256 matmul
N_CLASSES = 10
MAX_BATCH_TILE = 512  # fits comfortably in VMEM on v5e/v6e/v7x


def _round_up(n, m):
    return ((n + m - 1) // m) * m


def mlp_kernel(seed_ref, x_ref, w1_ref, b1_ref, w2_ref, b2_ref, w3_ref, b3_ref,
               w4_ref, b4_ref, o_ref, *, training):
    """One batch tile of the classifier forward pass (all layers fused)."""
    tile_id = pl.program_id(0)
    seed = seed_ref[0]

    def dropout(h, layer):
        if not training:
            return h  # nn.Dropout is identity in eval mode
        shape = h.shape
        # Unique 32-bit counter per element of this tile / layer / seed.
        r = lax.broadcasted_iota(jnp.int32, shape, 0).astype(jnp.uint32)
        c = lax.broadcasted_iota(jnp.int32, shape, 1).astype(jnp.uint32)
        idx = r * jnp.uint32(shape[1]) + c
        key = (seed.astype(jnp.uint32) * jnp.uint32(0x85EBCA6B)
               ^ (tile_id + 1).astype(jnp.uint32) * jnp.uint32(0xC2B2AE35)
               ^ jnp.uint32((layer + 1) * 0x27D4EB2F))
        # splitmix32-style mixer (pure VPU integer ops, works in interpret mode too).
        z = idx * jnp.uint32(0x9E3779B9) + key
        z = z ^ (z >> jnp.uint32(16))
        z = z * jnp.uint32(0x7FEB352D)
        z = z ^ (z >> jnp.uint32(15))
        z = z * jnp.uint32(0x846CA68B)
        z = z ^ (z >> jnp.uint32(16))
        # Single integer compare on the top 31 bits (no float conversion needed).
        keep = (z >> jnp.uint32(1)).astype(jnp.int32) >= jnp.int32(DROP_THRESHOLD_31)
        return jnp.where(keep, h * jnp.float32(KEEP_SCALE), jnp.float32(0.0))

    x = x_ref[...]  # bf16 (TB, 896)

    h = jnp.dot(x, w1_ref[...], preferred_element_type=jnp.float32) + b1_ref[...]
    h = dropout(jnp.maximum(h, 0.0), 0)

    h = jnp.dot(h.astype(jnp.bfloat16), w2_ref[...],
                preferred_element_type=jnp.float32) + b2_ref[...]
    h = dropout(jnp.maximum(h, 0.0), 1)

    h = jnp.dot(h.astype(jnp.bfloat16), w3_ref[...],
                preferred_element_type=jnp.float32) + b3_ref[...]
    h = dropout(jnp.maximum(h, 0.0), 2)

    logits = jnp.dot(h.astype(jnp.bfloat16), w4_ref[...],
                     preferred_element_type=jnp.float32) + b4_ref[...]

    # Numerically stable log_softmax over the class axis (dim=1).
    m = jnp.max(logits, axis=-1, keepdims=True)
    z = logits - m
    lse = jnp.log(jnp.sum(jnp.exp(z), axis=-1, keepdims=True))
    o_ref[...] = (z - lse).astype(o_ref.dtype)


def classifier_forward(x, params, *, training=True, seed=0):
    """x: [B, 1, 28, 28] (NCHW) or any shape with prod(trailing dims) == 784."""
    w1, b1, w2, b2, w3, b3, w4, b4 = params
    b = x.shape[0]
    xf = x.reshape(b, -1).astype(jnp.float32)
    assert xf.shape[1] == IN_FEATURES, "ClassifierWithDP expects 784 input features"

    # Pad the feature dim 784 -> 896 (zeros) and fold the same padding into W1 rows.
    xf = jnp.pad(xf, ((0, 0), (0, IN_PAD - IN_FEATURES)))
    w1p = jnp.pad(w1, ((0, IN_PAD - IN_FEATURES), (0, 0)))

    # Batch tile + padding: at least 8 rows (sublane), at most MAX_BATCH_TILE.
    tb = min(MAX_BATCH_TILE, _round_up(b, 8))
    b_pad = _round_up(b, tb)
    xf = jnp.pad(xf, ((0, b_pad - b), (0, 0)))

    # bf16 operands for the MXU; biases / accumulation / epilogue stay f32.
    xb = xf.astype(jnp.bfloat16)
    w1b = w1p.astype(jnp.bfloat16)
    w2b = w2.astype(jnp.bfloat16)
    w3b = w3.astype(jnp.bfloat16)
    w4b = w4.astype(jnp.bfloat16)
    b1f = b1.reshape(1, -1).astype(jnp.float32)
    b2f = b2.reshape(1, -1).astype(jnp.float32)
    b3f = b3.reshape(1, -1).astype(jnp.float32)
    b4f = b4.reshape(1, -1).astype(jnp.float32)

    kernel = functools.partial(mlp_kernel, training=training)
    grid = (b_pad // tb,)

    # Weights/biases map to block (0, 0) for every grid step -> VMEM-resident.
    grid_spec = pltpu.PrefetchScalarGridSpec(
        num_scalar_prefetch=1,
        grid=grid,
        in_specs=[
            pl.BlockSpec((tb, IN_PAD), lambda i, s: (i, 0)),     # x tile
            pl.BlockSpec((IN_PAD, 256), lambda i, s: (0, 0)),    # W1
            pl.BlockSpec((1, 256), lambda i, s: (0, 0)),         # b1
            pl.BlockSpec((256, 128), lambda i, s: (0, 0)),       # W2
            pl.BlockSpec((1, 128), lambda i, s: (0, 0)),         # b2
            pl.BlockSpec((128, 64), lambda i, s: (0, 0)),        # W3
            pl.BlockSpec((1, 64), lambda i, s: (0, 0)),          # b3
            pl.BlockSpec((64, N_CLASSES), lambda i, s: (0, 0)),  # W4
            pl.BlockSpec((1, N_CLASSES), lambda i, s: (0, 0)),   # b4
        ],
        out_specs=pl.BlockSpec((tb, N_CLASSES), lambda i, s: (i, 0)),
    )

    out = pl.pallas_call(
        kernel,
        out_shape=jax.ShapeDtypeStruct((b_pad, N_CLASSES), jnp.float32),
        grid_spec=grid_spec,
        compiler_params=pltpu.CompilerParams(
            dimension_semantics=("parallel",),  # megacore sharding on v7x
        ),
    )(jnp.asarray([seed], dtype=jnp.int32),
      xb, w1b, b1f, w2b, b2f, w3b, b3f, w4b, b4f)

    return out[:b]


def init_params(key):
    """Deterministic params matching the nn.Linear shapes.

    Weights are (in, out) so the kernel computes x @ W + b (== PyTorch x @ W.T + b
    with its (out, in) weights); biases are (1, out).
    """
    dims = [(784, 256), (256, 128), (128, 64), (64, 10)]
    params = []
    for fan_in, fan_out in dims:
        kw, kb, key = jax.random.split(key, 3)
        bound = 1.0 / jnp.sqrt(jnp.float32(fan_in))  # PyTorch default init range
        w = jax.random.uniform(kw, (fan_in, fan_out), jnp.float32, -bound, bound)
        bias = jax.random.uniform(kb, (1, fan_out), jnp.float32, -bound, bound)
        params.extend([w, bias])
    return tuple(params)


def _reference_eval(x, params):
    """Pure-JAX f32 reference of the eval-mode forward (dropout = identity)."""
    w1, b1, w2, b2, w3, b3, w4, b4 = params
    h = x.reshape(x.shape[0], -1).astype(jnp.float32)
    h = jnp.maximum(h @ w1 + b1, 0.0)
    h = jnp.maximum(h @ w2 + b2, 0.0)
    h = jnp.maximum(h @ w3 + b3, 0.0)
    logits = h @ w4 + b4
    return jax.nn.log_softmax(logits, axis=-1)


if __name__ == "__main__":
    key = jax.random.PRNGKey(0)
    kx, kp = jax.random.split(key)

    # NCHW MNIST-like input: batch=2, channels=1, 28x28 -> 784 features.
    x = jax.random.normal(kx, (2, 1, 28, 28), dtype=jnp.float32)
    params = init_params(kp)

    # Training mode: exercises the in-kernel dropout path (nn.Module default mode).
    out_train = classifier_forward(x, params, training=True, seed=0)
    out_train = jax.block_until_ready(out_train)
    assert out_train.shape == (2, 10)
    assert jnp.allclose(jnp.sum(jnp.exp(out_train), axis=1), 1.0, atol=1e-3)

    # Eval mode: deterministic, compare against a pure-JAX f32 reference
    # (loose tolerance: kernel matmuls run in bf16 with f32 accumulation).
    out_eval = classifier_forward(x, params, training=False, seed=0)
    out_eval = jax.block_until_ready(out_eval)
    ref = _reference_eval(x, params)
    assert out_eval.shape == (2, 10)
    assert jnp.allclose(jnp.sum(jnp.exp(out_eval), axis=1), 1.0, atol=1e-3)
    assert jnp.max(jnp.abs(out_eval - ref)) < 0.25

    print("KERNEL_OK")
</pallas_src>

<mosaic_0001>
module attributes {stable_mosaic.version = 11 : i64} {
  func.func @mlp_kernel(%arg0: i32, %arg1: memref<1xi32, #tpu.memory_space<smem>>, %arg2: memref<8x896xbf16, #tpu.memory_space<vmem>>, %arg3: memref<896x256xbf16, #tpu.memory_space<vmem>>, %arg4: memref<1x256xf32, #tpu.memory_space<vmem>>, %arg5: memref<256x128xbf16, #tpu.memory_space<vmem>>, %arg6: memref<1x128xf32, #tpu.memory_space<vmem>>, %arg7: memref<128x64xbf16, #tpu.memory_space<vmem>>, %arg8: memref<1x64xf32, #tpu.memory_space<vmem>>, %arg9: memref<64x10xbf16, #tpu.memory_space<vmem>>, %arg10: memref<1x10xf32, #tpu.memory_space<vmem>>, %arg11: memref<8x10xf32, #tpu.memory_space<vmem>>) attributes {dimension_semantics = [#tpu.dimension_semantics<parallel>], iteration_bounds = array<i64: 1>, scalar_prefetch = 1 : i64, scratch_operands = 0 : i64, tpu.core_type = #tpu.core_type<tc>, window_params = [{transform_indices = @transform_0, window_bounds = array<i64: 8, 896>}, {pipeline_mode = #tpu.pipeline_mode<synchronous>, transform_indices = @transform_1, window_bounds = array<i64: 896, 256>}, {pipeline_mode = #tpu.pipeline_mode<synchronous>, transform_indices = @transform_2, window_bounds = array<i64: 1, 256>}, {pipeline_mode = #tpu.pipeline_mode<synchronous>, transform_indices = @transform_3, window_bounds = array<i64: 256, 128>}, {pipeline_mode = #tpu.pipeline_mode<synchronous>, transform_indices = @transform_4, window_bounds = array<i64: 1, 128>}, {pipeline_mode = #tpu.pipeline_mode<synchronous>, transform_indices = @transform_5, window_bounds = array<i64: 128, 64>}, {pipeline_mode = #tpu.pipeline_mode<synchronous>, transform_indices = @transform_6, window_bounds = array<i64: 1, 64>}, {pipeline_mode = #tpu.pipeline_mode<synchronous>, transform_indices = @transform_7, window_bounds = array<i64: 64, 10>}, {pipeline_mode = #tpu.pipeline_mode<synchronous>, transform_indices = @transform_8, window_bounds = array<i64: 1, 10>}, {transform_indices = @transform_9, window_bounds = array<i64: 8, 10>}]} {
    %c0 = arith.constant 0 : index
    %0 = memref.load %arg1[%c0] : memref<1xi32, #tpu.memory_space<smem>>
    %c0_0 = arith.constant 0 : index
    %c0_1 = arith.constant 0 : index
    %1 = vector.load %arg2[%c0_0, %c0_1] : memref<8x896xbf16, #tpu.memory_space<vmem>>, vector<8x896xbf16>
    %c0_2 = arith.constant 0 : index
    %c0_3 = arith.constant 0 : index
    %2 = vector.load %arg3[%c0_2, %c0_3] : memref<896x256xbf16, #tpu.memory_space<vmem>>, vector<896x256xbf16>
    %cst = arith.constant dense<0.000000e+00> : vector<8x256xf32>
    %3 = tpu.matmul %1, %2, %cst {dimension_numbers = #tpu.dot_dimension_numbers<[1], [0], [0], [1], [0, 0, 1, 1], [], []>} : vector<8x896xbf16>, vector<896x256xbf16>, vector<8x256xf32> -> vector<8x256xf32>
    %c0_4 = arith.constant 0 : index
    %c0_5 = arith.constant 0 : index
    %4 = vector.load %arg4[%c0_4, %c0_5] : memref<1x256xf32, #tpu.memory_space<vmem>>, vector<1x256xf32>
    %5 = vector.broadcast %4 : vector<1x256xf32> to vector<8x256xf32>
    %6 = arith.addf %3, %5 : vector<8x256xf32>
    %cst_6 = arith.constant 0.000000e+00 : f32
    %7 = vector.broadcast %cst_6 : f32 to vector<8x256xf32>
    %8 = arith.maximumf %6, %7 : vector<8x256xf32>
    %9 = tpu.iota {dimensions = array<i32: 0>} : vector<8x256xi32>
    %10 = tpu.iota {dimensions = array<i32: 1>} : vector<8x256xi32>
    %c256_i32 = arith.constant 256 : i32
    %11 = vector.broadcast %c256_i32 : i32 to vector<8x256xi32>
    %12 = arith.muli %9, %11 : vector<8x256xi32>
    %13 = arith.addi %12, %10 : vector<8x256xi32>
    %c-2048144789_i32 = arith.constant -2048144789 : i32
    %14 = arith.muli %0, %c-2048144789_i32 : i32
    %c1_i32 = arith.constant 1 : i32
    %15 = arith.addi %arg0, %c1_i32 : i32
    %c-1028477387_i32 = arith.constant -1028477387 : i32
    %16 = arith.muli %15, %c-1028477387_i32 : i32
    %17 = arith.xori %14, %16 : i32
    %c668265263_i32 = arith.constant 668265263 : i32
    %18 = arith.xori %17, %c668265263_i32 : i32
    %c-1640531527_i32 = arith.constant -1640531527 : i32
    %19 = vector.broadcast %c-1640531527_i32 : i32 to vector<8x256xi32>
    %20 = arith.muli %13, %19 : vector<8x256xi32>
    %21 = vector.broadcast %18 : i32 to vector<8x256xi32>
    %22 = arith.addi %20, %21 : vector<8x256xi32>
    %c16_i32 = arith.constant 16 : i32
    %23 = vector.broadcast %c16_i32 : i32 to vector<8x256xi32>
    %24 = arith.shrui %22, %23 : vector<8x256xi32>
    %25 = arith.xori %22, %24 : vector<8x256xi32>
    %c2146121005_i32 = arith.constant 2146121005 : i32
    %26 = vector.broadcast %c2146121005_i32 : i32 to vector<8x256xi32>
    %27 = arith.muli %25, %26 : vector<8x256xi32>
    %c15_i32 = arith.constant 15 : i32
    %28 = vector.broadcast %c15_i32 : i32 to vector<8x256xi32>
    %29 = arith.shrui %27, %28 : vector<8x256xi32>
    %30 = arith.xori %27, %29 : vector<8x256xi32>
    %c-2073254261_i32 = arith.constant -2073254261 : i32
    %31 = vector.broadcast %c-2073254261_i32 : i32 to vector<8x256xi32>
    %32 = arith.muli %30, %31 : vector<8x256xi32>
    %c16_i32_7 = arith.constant 16 : i32
    %33 = vector.broadcast %c16_i32_7 : i32 to vector<8x256xi32>
    %34 = arith.shrui %32, %33 : vector<8x256xi32>
    %35 = arith.xori %32, %34 : vector<8x256xi32>
    %c1_i32_8 = arith.constant 1 : i32
    %36 = vector.broadcast %c1_i32_8 : i32 to vector<8x256xi32>
    %37 = arith.shrui %35, %36 : vector<8x256xi32>
    %c429496729_i32 = arith.constant 429496729 : i32
    %38 = vector.broadcast %c429496729_i32 : i32 to vector<8x256xi32>
    %39 = arith.cmpi sge, %37, %38 : vector<8x256xi32>
    %cst_9 = arith.constant 1.250000e+00 : f32
    %40 = vector.broadcast %cst_9 : f32 to vector<8x256xf32>
    %41 = arith.mulf %8, %40 : vector<8x256xf32>
    %cst_10 = arith.constant 0.000000e+00 : f32
    %42 = vector.broadcast %cst_10 : f32 to vector<8x256xf32>
    %43 = arith.select %39, %41, %42 : vector<8x256xi1>, vector<8x256xf32>
    %44 = arith.truncf %43 : vector<8x256xf32> to vector<8x256xbf16>
    %c0_11 = arith.constant 0 : index
    %c0_12 = arith.constant 0 : index
    %45 = vector.load %arg5[%c0_11, %c0_12] : memref<256x128xbf16, #tpu.memory_space<vmem>>, vector<256x128xbf16>
    %cst_13 = arith.constant dense<0.000000e+00> : vector<8x128xf32>
    %46 = tpu.matmul %44, %45, %cst_13 {dimension_numbers = #tpu.dot_dimension_numbers<[1], [0], [0], [1], [0, 0, 1, 1], [], []>} : vector<8x256xbf16>, vector<256x128xbf16>, vector<8x128xf32> -> vector<8x128xf32>
    %c0_14 = arith.constant 0 : index
    %c0_15 = arith.constant 0 : index
    %47 = vector.load %arg6[%c0_14, %c0_15] : memref<1x128xf32, #tpu.memory_space<vmem>>, vector<1x128xf32>
    %48 = vector.broadcast %47 : vector<1x128xf32> to vector<8x128xf32>
    %49 = arith.addf %46, %48 : vector<8x128xf32>
    %cst_16 = arith.constant 0.000000e+00 : f32
    %50 = vector.broadcast %cst_16 : f32 to vector<8x128xf32>
    %51 = arith.maximumf %49, %50 : vector<8x128xf32>
    %52 = tpu.iota {dimensions = array<i32: 0>} : vector<8x128xi32>
    %53 = tpu.iota {dimensions = array<i32: 1>} : vector<8x128xi32>
    %c128_i32 = arith.constant 128 : i32
    %54 = vector.broadcast %c128_i32 : i32 to vector<8x128xi32>
    %55 = arith.muli %52, %54 : vector<8x128xi32>
    %56 = arith.addi %55, %53 : vector<8x128xi32>
    %c-2048144789_i32_17 = arith.constant -2048144789 : i32
    %57 = arith.muli %0, %c-2048144789_i32_17 : i32
    %c1_i32_18 = arith.constant 1 : i32
    %58 = arith.addi %arg0, %c1_i32_18 : i32
    %c-1028477387_i32_19 = arith.constant -1028477387 : i32
    %59 = arith.muli %58, %c-1028477387_i32_19 : i32
    %60 = arith.xori %57, %59 : i32
    %c1336530526_i32 = arith.constant 1336530526 : i32
    %61 = arith.xori %60, %c1336530526_i32 : i32
    %c-1640531527_i32_20 = arith.constant -1640531527 : i32
    %62 = vector.broadcast %c-1640531527_i32_20 : i32 to vector<8x128xi32>
    %63 = arith.muli %56, %62 : vector<8x128xi32>
    %64 = vector.broadcast %61 : i32 to vector<8x128xi32>
    %65 = arith.addi %63, %64 : vector<8x128xi32>
    %c16_i32_21 = arith.constant 16 : i32
    %66 = vector.broadcast %c16_i32_21 : i32 to vector<8x128xi32>
    %67 = arith.shrui %65, %66 : vector<8x128xi32>
    %68 = arith.xori %65, %67 : vector<8x128xi32>
    %c2146121005_i32_22 = arith.constant 2146121005 : i32
    %69 = vector.broadcast %c2146121005_i32_22 : i32 to vector<8x128xi32>
    %70 = arith.muli %68, %69 : vector<8x128xi32>
    %c15_i32_23 = arith.constant 15 : i32
    %71 = vector.broadcast %c15_i32_23 : i32 to vector<8x128xi32>
    %72 = arith.shrui %70, %71 : vector<8x128xi32>
    %73 = arith.xori %70, %72 : vector<8x128xi32>
    %c-2073254261_i32_24 = arith.constant -2073254261 : i32
    %74 = vector.broadcast %c-2073254261_i32_24 : i32 to vector<8x128xi32>
    %75 = arith.muli %73, %74 : vector<8x128xi32>
    %c16_i32_25 = arith.constant 16 : i32
    %76 = vector.broadcast %c16_i32_25 : i32 to vector<8x128xi32>
    %77 = arith.shrui %75, %76 : vector<8x128xi32>
    %78 = arith.xori %75, %77 : vector<8x128xi32>
    %c1_i32_26 = arith.constant 1 : i32
    %79 = vector.broadcast %c1_i32_26 : i32 to vector<8x128xi32>
    %80 = arith.shrui %78, %79 : vector<8x128xi32>
    %c429496729_i32_27 = arith.constant 429496729 : i32
    %81 = vector.broadcast %c429496729_i32_27 : i32 to vector<8x128xi32>
    %82 = arith.cmpi sge, %80, %81 : vector<8x128xi32>
    %cst_28 = arith.constant 1.250000e+00 : f32
    %83 = vector.broadcast %cst_28 : f32 to vector<8x128xf32>
    %84 = arith.mulf %51, %83 : vector<8x128xf32>
    %cst_29 = arith.constant 0.000000e+00 : f32
    %85 = vector.broadcast %cst_29 : f32 to vector<8x128xf32>
    %86 = arith.select %82, %84, %85 : vector<8x128xi1>, vector<8x128xf32>
    %87 = arith.truncf %86 : vector<8x128xf32> to vector<8x128xbf16>
    %c0_30 = arith.constant 0 : index
    %c0_31 = arith.constant 0 : index
    %88 = vector.load %arg7[%c0_30, %c0_31] : memref<128x64xbf16, #tpu.memory_space<vmem>>, vector<128x64xbf16>
    %cst_32 = arith.constant dense<0.000000e+00> : vector<8x64xf32>
    %89 = tpu.matmul %87, %88, %cst_32 {dimension_numbers = #tpu.dot_dimension_numbers<[1], [0], [0], [1], [0, 0, 1, 1], [], []>} : vector<8x128xbf16>, vector<128x64xbf16>, vector<8x64xf32> -> vector<8x64xf32>
    %c0_33 = arith.constant 0 : index
    %c0_34 = arith.constant 0 : index
    %90 = vector.load %arg8[%c0_33, %c0_34] : memref<1x64xf32, #tpu.memory_space<vmem>>, vector<1x64xf32>
    %91 = vector.broadcast %90 : vector<1x64xf32> to vector<8x64xf32>
    %92 = arith.addf %89, %91 : vector<8x64xf32>
    %cst_35 = arith.constant 0.000000e+00 : f32
    %93 = vector.broadcast %cst_35 : f32 to vector<8x64xf32>
    %94 = arith.maximumf %92, %93 : vector<8x64xf32>
    %95 = tpu.iota {dimensions = array<i32: 0>} : vector<8x64xi32>
    %96 = tpu.iota {dimensions = array<i32: 1>} : vector<8x64xi32>
    %c64_i32 = arith.constant 64 : i32
    %97 = vector.broadcast %c64_i32 : i32 to vector<8x64xi32>
    %98 = arith.muli %95, %97 : vector<8x64xi32>
    %99 = arith.addi %98, %96 : vector<8x64xi32>
    %c-2048144789_i32_36 = arith.constant -2048144789 : i32
    %100 = arith.muli %0, %c-2048144789_i32_36 : i32
    %c1_i32_37 = arith.constant 1 : i32
    %101 = arith.addi %arg0, %c1_i32_37 : i32
    %c-1028477387_i32_38 = arith.constant -1028477387 : i32
    %102 = arith.muli %101, %c-1028477387_i32_38 : i32
    %103 = arith.xori %100, %102 : i32
    %c2004795789_i32 = arith.constant 2004795789 : i32
    %104 = arith.xori %103, %c2004795789_i32 : i32
    %c-1640531527_i32_39 = arith.constant -1640531527 : i32
    %105 = vector.broadcast %c-1640531527_i32_39 : i32 to vector<8x64xi32>
    %106 = arith.muli %99, %105 : vector<8x64xi32>
    %107 = vector.broadcast %104 : i32 to vector<8x64xi32>
    %108 = arith.addi %106, %107 : vector<8x64xi32>
    %c16_i32_40 = arith.constant 16 : i32
    %109 = vector.broadcast %c16_i32_40 : i32 to vector<8x64xi32>
    %110 = arith.shrui %108, %109 : vector<8x64xi32>
    %111 = arith.xori %108, %110 : vector<8x64xi32>
    %c2146121005_i32_41 = arith.constant 2146121005 : i32
    %112 = vector.broadcast %c2146121005_i32_41 : i32 to vector<8x64xi32>
    %113 = arith.muli %111, %112 : vector<8x64xi32>
    %c15_i32_42 = arith.constant 15 : i32
    %114 = vector.broadcast %c15_i32_42 : i32 to vector<8x64xi32>
    %115 = arith.shrui %113, %114 : vector<8x64xi32>
    %116 = arith.xori %113, %115 : vector<8x64xi32>
    %c-2073254261_i32_43 = arith.constant -2073254261 : i32
    %117 = vector.broadcast %c-2073254261_i32_43 : i32 to vector<8x64xi32>
    %118 = arith.muli %116, %117 : vector<8x64xi32>
    %c16_i32_44 = arith.constant 16 : i32
    %119 = vector.broadcast %c16_i32_44 : i32 to vector<8x64xi32>
    %120 = arith.shrui %118, %119 : vector<8x64xi32>
    %121 = arith.xori %118, %120 : vector<8x64xi32>
    %c1_i32_45 = arith.constant 1 : i32
    %122 = vector.broadcast %c1_i32_45 : i32 to vector<8x64xi32>
    %123 = arith.shrui %121, %122 : vector<8x64xi32>
    %c429496729_i32_46 = arith.constant 429496729 : i32
    %124 = vector.broadcast %c429496729_i32_46 : i32 to vector<8x64xi32>
    %125 = arith.cmpi sge, %123, %124 : vector<8x64xi32>
    %cst_47 = arith.constant 1.250000e+00 : f32
    %126 = vector.broadcast %cst_47 : f32 to vector<8x64xf32>
    %127 = arith.mulf %94, %126 : vector<8x64xf32>
    %cst_48 = arith.constant 0.000000e+00 : f32
    %128 = vector.broadcast %cst_48 : f32 to vector<8x64xf32>
    %129 = arith.select %125, %127, %128 : vector<8x64xi1>, vector<8x64xf32>
    %130 = arith.truncf %129 : vector<8x64xf32> to vector<8x64xbf16>
    %c0_49 = arith.constant 0 : index
    %c0_50 = arith.constant 0 : index
    %131 = vector.load %arg9[%c0_49, %c0_50] : memref<64x10xbf16, #tpu.memory_space<vmem>>, vector<64x10xbf16>
    %cst_51 = arith.constant dense<0.000000e+00> : vector<8x10xf32>
    %132 = tpu.matmul %130, %131, %cst_51 {dimension_numbers = #tpu.dot_dimension_numbers<[1], [0], [0], [1], [0, 0, 1, 1], [], []>} : vector<8x64xbf16>, vector<64x10xbf16>, vector<8x10xf32> -> vector<8x10xf32>
    %c0_52 = arith.constant 0 : index
    %c0_53 = arith.constant 0 : index
    %133 = vector.load %arg10[%c0_52, %c0_53] : memref<1x10xf32, #tpu.memory_space<vmem>>, vector<1x10xf32>
    %134 = vector.broadcast %133 : vector<1x10xf32> to vector<8x10xf32>
    %135 = arith.addf %132, %134 : vector<8x10xf32>
    %cst_54 = arith.constant dense<0xFF800000> : vector<8xf32>
    %136 = vector.multi_reduction <maximumf>, %135, %cst_54 [1] : vector<8x10xf32> to vector<8xf32>
    %137 = vector.shape_cast %136 : vector<8xf32> to vector<8x1xf32>
    %138 = vector.broadcast %137 : vector<8x1xf32> to vector<8x10xf32>
    %139 = arith.subf %135, %138 : vector<8x10xf32>
    %140 = math.exp %139 : vector<8x10xf32>
    %cst_55 = arith.constant dense<0.000000e+00> : vector<8xf32>
    %141 = vector.multi_reduction <add>, %140, %cst_55 [1] : vector<8x10xf32> to vector<8xf32>
    %142 = vector.shape_cast %141 : vector<8xf32> to vector<8x1xf32>
    %143 = math.log %142 : vector<8x1xf32>
    %144 = vector.broadcast %143 : vector<8x1xf32> to vector<8x10xf32>
    %145 = arith.subf %139, %144 : vector<8x10xf32>
    %c0_56 = arith.constant 0 : index
    %c0_57 = arith.constant 0 : index
    %146 = vector.load %arg11[%c0_56, %c0_57] : memref<8x10xf32, #tpu.memory_space<vmem>>, vector<8x10xf32>
    tpu.vector_store %arg11[%c0_56, %c0_57], %145 {strides = array<i32>} : memref<8x10xf32, #tpu.memory_space<vmem>>, vector<8x10xf32>,
    return
  }
  func.func @transform_0(%arg0: i32, %arg1: memref<1xi32, #tpu.memory_space<smem>>) -> (i32, i32) {
    %c0_i32 = arith.constant 0 : i32
    %c0_i32_0 = arith.constant 0 : i32
    return %arg0, %c0_i32 : i32, i32
  }
  func.func @transform_1(%arg0: i32, %arg1: memref<1xi32, #tpu.memory_space<smem>>) -> (i32, i32) {
    %c0_i32 = arith.constant 0 : i32
    %c0_i32_0 = arith.constant 0 : i32
    %c0_i32_1 = arith.constant 0 : i32
    return %c0_i32, %c0_i32_0 : i32, i32
  }
  func.func @transform_2(%arg0: i32, %arg1: memref<1xi32, #tpu.memory_space<smem>>) -> (i32, i32) {
    %c0_i32 = arith.constant 0 : i32
    %c0_i32_0 = arith.constant 0 : i32
    %c0_i32_1 = arith.constant 0 : i32
    return %c0_i32, %c0_i32_0 : i32, i32
  }
  func.func @transform_3(%arg0: i32, %arg1: memref<1xi32, #tpu.memory_space<smem>>) -> (i32, i32) {
    %c0_i32 = arith.constant 0 : i32
    %c0_i32_0 = arith.constant 0 : i32
    %c0_i32_1 = arith.constant 0 : i32
    return %c0_i32, %c0_i32_0 : i32, i32
  }
  func.func @transform_4(%arg0: i32, %arg1: memref<1xi32, #tpu.memory_space<smem>>) -> (i32, i32) {
    %c0_i32 = arith.constant 0 : i32
    %c0_i32_0 = arith.constant 0 : i32
    %c0_i32_1 = arith.constant 0 : i32
    return %c0_i32, %c0_i32_0 : i32, i32
  }
  func.func @transform_5(%arg0: i32, %arg1: memref<1xi32, #tpu.memory_space<smem>>) -> (i32, i32) {
    %c0_i32 = arith.constant 0 : i32
    %c0_i32_0 = arith.constant 0 : i32
    %c0_i32_1 = arith.constant 0 : i32
    return %c0_i32, %c0_i32_0 : i32, i32
  }
  func.func @transform_6(%arg0: i32, %arg1: memref<1xi32, #tpu.memory_space<smem>>) -> (i32, i32) {
    %c0_i32 = arith.constant 0 : i32
    %c0_i32_0 = arith.constant 0 : i32
    %c0_i32_1 = arith.constant 0 : i32
    return %c0_i32, %c0_i32_0 : i32, i32
  }
  func.func @transform_7(%arg0: i32, %arg1: memref<1xi32, #tpu.memory_space<smem>>) -> (i32, i32) {
    %c0_i32 = arith.constant 0 : i32
    %c0_i32_0 = arith.constant 0 : i32
    %c0_i32_1 = arith.constant 0 : i32
    return %c0_i32, %c0_i32_0 : i32, i32
  }
  func.func @transform_8(%arg0: i32, %arg1: memref<1xi32, #tpu.memory_space<smem>>) -> (i32, i32) {
    %c0_i32 = arith.constant 0 : i32
    %c0_i32_0 = arith.constant 0 : i32
    %c0_i32_1 = arith.constant 0 : i32
    return %c0_i32, %c0_i32_0 : i32, i32
  }
  func.func @transform_9(%arg0: i32, %arg1: memref<1xi32, #tpu.memory_space<smem>>) -> (i32, i32) {
    %c0_i32 = arith.constant 0 : i32
    %c0_i32_0 = arith.constant 0 : i32
    return %arg0, %c0_i32 : i32, i32
  }
}

</mosaic_0001>

<bundles_post_ra>
// kernel: tpu_custom_call.1
= control target key start
LH: loop header
LB: loop body
LE: loop exit
PB: predicated region body
PF: predicated region fallthrough
CT: control target
= control target key end

     0   :  { %16 = vsyncpa [#allocation5], 0  ;;  %s2355_s0 = inlined_call_operand.<no memory space> [shape: s32[1], index: 0, kind: input, shape index: {}]   ;;  %s2356_s1 = inlined_call_operand.vmem [shape: bf16[8,896], index: 1, kind: input, shape index: {}]   ;;  %s2357_s2 = inlined_call_operand.hbm [shape: bf16[896,256], index: 2, kind: input, shape index: {}]   ;;  %s2358_s3 = inlined_call_operand.vmem [shape: f32[1,256], index: 3, kind: input, shape index: {}]   ;;  %s2359_s4 = inlined_call_operand.hbm [shape: bf16[256,128], index: 4, kind: input, shape index: {}]   ;;  %s2360_s5 = inlined_call_operand.vmem [shape: f32[1,128], index: 5, kind: input, shape index: {}]   ;;  %s2361_s6 = inlined_call_operand.vmem [shape: bf16[128,64], index: 6, kind: input, shape index: {}]   ;;  %s2362_s7 = inlined_call_operand.vmem [shape: f32[1,64], index: 7, kind: input, shape index: {}]   ;;  %s2363_s8 = inlined_call_operand.vmem [shape: bf16[64,10], index: 8, kind: input, shape index: {}]   ;;  %s2364_s9 = inlined_call_operand.vmem [shape: f32[1,10], index: 9, kind: input, shape index: {}]   ;;  %s2365_s10 = inlined_call_operand.hbm [shape: f32[8,10], index: 10, kind: output, shape index: {}]  }
   0x1   :  { %17 = vsyncpa [#allocation8], 0 }
   0x2   :  { %18 = vsyncpa [#allocation6], 0  ;;  %s25_s15 = sshll.u32 %s2357_s2, 4  ;;  %s2170_s16 = smov [#allocation4]   ;;  %s26_s15 = int_to_ptr.hbm [resolvable:$true] %s25_s15 }
   0x3   :  { %s27_s17 = sshll.u32 %s2170_s16, 4  ;;  %s40_s20 = sshll.u32 %s2359_s4, 4  ;;  %s28_s17 = int_to_ptr.vmem [resolvable:$true] %s27_s17  ;;  %s41_s20 = int_to_ptr.hbm [resolvable:$true] %s40_s20 }
   0x4   :  { %s2171_s21 = smov 128   ;;  %s2172_s22 = smov 8  }
   0x5   :  { %33 = dma.hbm_to_vmem [thread:$0]  %s26_s15, 14336, %s28_s17, [#allocation5], %s2171_s21, %s2171_s21, %s2172_s22  }
   0x6   :  { %s2173_s23 = smov [#allocation7]   ;;  %s2174_s25 = smov 64  }
   0x7   :  { %s42_s24 = sshll.u32 %s2173_s23, 4  ;;  %s2175_s26 = smov 4   ;;  %s43_s24 = int_to_ptr.vmem [resolvable:$true] %s42_s24 }
   0x8   :  { %48 = dma.hbm_to_vmem [thread:$0]  %s41_s20, 2048, %s43_s24, [#allocation8], %s2174_s25, %s2174_s25, %s2175_s26  }
   0x9   :  { %2164 = dma.done.wait [#allocation5], 14336  }
   0xa   :  { %2165 = vsyncadd [#allocation5], 4294952960 }
   0xb   :  { %2166 = dma.done.wait [#allocation8], 2048  }
   0xc   :  { %2167 = vsyncadd [#allocation8], 4294965248  ;;  %v1426_v0 = vld [vmem:[#allocation4 + $0x70] sm:$0xf]  ;;  %v1953_v1 = vld [vmem:[#allocation4 + $0x74] sm:$0xf0] }
   0xd   :  { %v1490_v2 = vld [vmem:[#allocation4 + $0xf0] sm:$0xf]  ;;  %v1427_v3 = vor.u32 %v1953_v1, %v1426_v0  ;;  %v1969_v4 = vld [vmem:[#allocation4 + $0xf4] sm:$0xf0]  ;;  %v1418_v9 = vld [vmem:[#allocation4 + $0x60] sm:$0xf] }
   0xe   :  { %v1554_v5 = vld [vmem:[#allocation4 + $0x170] sm:$0xf]  ;;  %v1985_v6 = vld [vmem:[#allocation4 + $0x174] sm:$0xf0]  ;;  %v1491_v7 = vor.u32 %v1969_v4, %v1490_v2  ;;  %v1951_v10 = vld [vmem:[#allocation4 + $0x64] sm:$0xf0] }
   0xf   :  { %v1555_v8 = vor.u32 %v1985_v6, %v1554_v5  ;;  %v1482_v11 = vld [vmem:[#allocation4 + $0xe0] sm:$0xf]  ;;  %776 = vmatpush.bf16.msra.mxu0 %v1427_v3  ;;  %v1419_v12 = vor.u32 %v1951_v10, %v1418_v9  ;;  %v1967_v13 = vld [vmem:[#allocation4 + $0xe4] sm:$0xf0]  ;;  %v1410_v18 = vld [vmem:[#allocation4 + $0x50] sm:$0xf] }
  0x10   :  { %v1546_v14 = vld [vmem:[#allocation4 + $0x160] sm:$0xf]  ;;  %v1983_v15 = vld [vmem:[#allocation4 + $0x164] sm:$0xf0]  ;;  %789 = vmatpush.bf16.msra.mxu1 %v1491_v7  ;;  %v1483_v16 = vor.u32 %v1967_v13, %v1482_v11  ;;  %v1949_v19 = vld [vmem:[#allocation4 + $0x54] sm:$0xf0] }
  0x11   :  { %802 = vmatpush.bf16.msra.mxu2 %v1555_v8  ;;  %v1547_v17 = vor.u32 %v1983_v15, %v1546_v14  ;;  %v1474_v20 = vld [vmem:[#allocation4 + $0xd0] sm:$0xf]  ;;  %v1965_v21 = vld [vmem:[#allocation4 + $0xd4] sm:$0xf0]  ;;  %v1411_v24 = vor.u32 %v1949_v19, %v1410_v18  ;;  %v1402_v25 = vld [vmem:[#allocation4 + $0x40] sm:$0xf] }
  0x12   :  { %v1538_v22 = vld [vmem:[#allocation4 + $0x150] sm:$0xf]  ;;  %v1981_v23 = vld [vmem:[#allocation4 + $0x154] sm:$0xf0]  ;;  %v1947_v26 = vld [vmem:[#allocation4 + $0x44] sm:$0xf0]  ;;  %v1475_v27 = vor.u32 %v1965_v21, %v1474_v20 }
  0x13   :  { %777 = vmatpush.bf16.msra.mxu0 %v1419_v12  ;;  %v1539_v28 = vor.u32 %v1981_v23, %v1538_v22  ;;  %v1466_v29 = vld [vmem:[#allocation4 + $0xc0] sm:$0xf]  ;;  %v1618_v30 = vld [vmem:[#allocation4 + $0x1f0] sm:$0xf]  ;;  %v2001_v31 = vld [vmem:[#allocation4 + $0x1f4] sm:$0xf0]  ;;  %v1403_v37 = vor.u32 %v1947_v26, %v1402_v25 }
  0x14   :  { %790 = vmatpush.bf16.msra.mxu1 %v1483_v16  ;;  %v1963_v32 = vld [vmem:[#allocation4 + $0xc4] sm:$0xf0]  ;;  %v1530_v33 = vld [vmem:[#allocation4 + $0x140] sm:$0xf]  ;;  %v1619_v35 = vor.u32 %v2001_v31, %v1618_v30  ;;  %v1394_v38 = vld [vmem:[#allocation4 + $0x30] sm:$0xf] }
  0x15   :  { %803 = vmatpush.bf16.msra.mxu2 %v1547_v17  ;;  %v1979_v34 = vld [vmem:[#allocation4 + $0x144] sm:$0xf0]  ;;  %v1610_v36 = vld [vmem:[#allocation4 + $0x1e0] sm:$0xf]  ;;  %v1945_v39 = vld [vmem:[#allocation4 + $0x34] sm:$0xf0]  ;;  %v1467_v41 = vor.u32 %v1963_v32, %v1466_v29 }
  0x16   :  { %815 = vmatpush.bf16.msra.mxu3 %v1619_v35  ;;  %v1999_v40 = vld [vmem:[#allocation4 + $0x1e4] sm:$0xf0]  ;;  %v1531_v42 = vor.u32 %v1979_v34, %v1530_v33  ;;  %v1458_v43 = vld [vmem:[#allocation4 + $0xb0] sm:$0xf]  ;;  %v1961_v44 = vld [vmem:[#allocation4 + $0xb4] sm:$0xf0]  ;;  %v1395_v50 = vor.u32 %v1945_v39, %v1394_v38 }
  0x17   :  { %778 = vmatpush.bf16.msra.mxu0 %v1411_v24  ;;  %v1522_v45 = vld [vmem:[#allocation4 + $0x130] sm:$0xf]  ;;  %v1611_v46 = vor.u32 %v1999_v40, %v1610_v36  ;;  %v1977_v47 = vld [vmem:[#allocation4 + $0x134] sm:$0xf0]  ;;  %v1386_v51 = vld [vmem:[#allocation4 + $0x20] sm:$0xf]  ;;  %v1459_v54 = vor.u32 %v1961_v44, %v1458_v43 }
  0x18   :  { %791 = vmatpush.bf16.msra.mxu1 %v1475_v27  ;;  %v1602_v48 = vld [vmem:[#allocation4 + $0x1d0] sm:$0xf]  ;;  %v1997_v49 = vld [vmem:[#allocation4 + $0x1d4] sm:$0xf0]  ;;  %v1943_v52 = vld [vmem:[#allocation4 + $0x24] sm:$0xf0]  ;;  %v1523_v55 = vor.u32 %v1977_v47, %v1522_v45 }
  0x19   :  { %804 = vmatpush.bf16.msra.mxu2 %v1539_v28  ;;  %v1603_v53 = vor.u32 %v1997_v49, %v1602_v48  ;;  %v1450_v56 = vld [vmem:[#allocation4 + $0xa0] sm:$0xf]  ;;  %v1995_v58 = vld [vmem:[#allocation4 + $0x1c4] sm:$0xf0]  ;;  %v1387_v62 = vor.u32 %v1943_v52, %v1386_v51  ;;  %v1378_v63 = vld [vmem:[#allocation4 + $0x10] sm:$0xf] }
  0x1a   :  { %816 = vmatpush.bf16.msra.mxu3 %v1611_v46  ;;  %v1594_v57 = vld [vmem:[#allocation4 + $0x1c0] sm:$0xf]  ;;  %v1959_v59 = vld [vmem:[#allocation4 + $0xa4] sm:$0xf0]  ;;  %v1941_v0 = vld [vmem:[#allocation4 + $0x14] sm:$0xf0] }
  0x1b   :  { %779 = vmatpush.bf16.msra.mxu0 %v1403_v37  ;;  %v1514_v60 = vld [vmem:[#allocation4 + $0x120] sm:$0xf]  ;;  %v1975_v61 = vld [vmem:[#allocation4 + $0x124] sm:$0xf0]  ;;  %v1595_v1 = vor.u32 %v1995_v58, %v1594_v57  ;;  %v1451_v2 = vor.u32 %v1959_v59, %v1450_v56  ;;  %v1442_v4 = vld [vmem:[#allocation4 + $0x90] sm:$0xf]  ;;  %v1379_v10 = vor.u32 %v1941_v0, %v1378_v63 }
  0x1c   :  { %792 = vmatpush.bf16.msra.mxu1 %v1467_v41  ;;  %v1515_v3 = vor.u32 %v1975_v61, %v1514_v60  ;;  %v1586_v5 = vld [vmem:[#allocation4 + $0x1b0] sm:$0xf]  ;;  %v1993_v6 = vld [vmem:[#allocation4 + $0x1b4] sm:$0xf0]  ;;  %v1370_v11 = vld [vmem:[#allocation4] sm:$0xf] }
  0x1d   :  { %805 = vmatpush.bf16.msra.mxu2 %v1531_v42  ;;  %v1957_v7 = vld [vmem:[#allocation4 + $0x94] sm:$0xf0]  ;;  %v1506_v8 = vld [vmem:[#allocation4 + $0x110] sm:$0xf]  ;;  %v1939_v12 = vld [vmem:[#allocation4 + $0x4] sm:$0xf0]  ;;  %v1587_v14 = vor.u32 %v1993_v6, %v1586_v5 }
  0x1e   :  { %817 = vmatpush.bf16.msra.mxu3 %v1603_v53  ;;  %v1973_v9 = vld [vmem:[#allocation4 + $0x114] sm:$0xf0]  ;;  %v1434_v13 = vld [vmem:[#allocation4 + $0x80] sm:$0xf]  ;;  %v1443_v15 = vor.u32 %v1957_v7, %v1442_v4  ;;  %v1955_v17 = vld [vmem:[#allocation4 + $0x84] sm:$0xf0]  ;;  %v1371_v26 = vor.u32 %v1939_v12, %v1370_v11 }
  0x1f   :  { %780 = vmatpush.bf16.msra.mxu0 %v1395_v50  ;;  %v1507_v16 = vor.u32 %v1973_v9, %v1506_v8  ;;  %v1578_v18 = vld [vmem:[#allocation4 + $0x1a0] sm:$0xf]  ;;  %v1991_v19 = vld [vmem:[#allocation4 + $0x1a4] sm:$0xf0]  ;;  %v1682_v22 = vld [vmem:[#allocation4 + $0x270] sm:$0xf]  ;;  %v1435_v30 = vor.u32 %v1955_v17, %v1434_v13 }
  0x20   :  { %793 = vmatpush.bf16.msra.mxu1 %v1459_v54  ;;  %v1498_v20 = vld [vmem:[#allocation4 + $0x100] sm:$0xf]  ;;  %v1971_v21 = vld [vmem:[#allocation4 + $0x104] sm:$0xf0]  ;;  %v2017_v23 = vld [vmem:[#allocation4 + $0x274] sm:$0xf0]  ;;  %v1579_v29 = vor.u32 %v1991_v19, %v1578_v18 }
  0x21   :  { %806 = vmatpush.bf16.msra.mxu2 %v1523_v55  ;;  %v1746_v24 = vld [vmem:[#allocation4 + $0x2f0] sm:$0xf]  ;;  %v2033_v25 = vld [vmem:[#allocation4 + $0x2f4] sm:$0xf0]  ;;  %v1499_v31 = vor.u32 %v1971_v21, %v1498_v20  ;;  %v1683_v34 = vor.u32 %v2017_v23, %v1682_v22  ;;  %v1674_v36 = vld [vmem:[#allocation4 + $0x260] sm:$0xf] }
  0x22   :  { %818 = vmatpush.bf16.msra.mxu3 %v1595_v1  ;;  %v1810_v27 = vld [vmem:[#allocation4 + $0x370] sm:$0xf]  ;;  %v2049_v28 = vld [vmem:[#allocation4 + $0x374] sm:$0xf0]  ;;  %v1747_v35 = vor.u32 %v2033_v25, %v1746_v24  ;;  %v2015_v37 = vld [vmem:[#allocation4 + $0x264] sm:$0xf0] }
  0x23   :  { %781 = vmatpush.bf16.msra.mxu0 %v1387_v62  ;;  %v1570_v32 = vld [vmem:[#allocation4 + $0x190] sm:$0xf]  ;;  %v1989_v33 = vld [vmem:[#allocation4 + $0x194] sm:$0xf0]  ;;  %v1811_v38 = vor.u32 %v2049_v28, %v1810_v27  ;;  %v1738_v39 = vld [vmem:[#allocation4 + $0x2e0] sm:$0xf]  ;;  %v1675_v46 = vor.u32 %v2015_v37, %v1674_v36 }
  0x24   :  { %794 = vmatpush.bf16.msra.mxu1 %v1451_v2  ;;  %v2031_v40 = vld [vmem:[#allocation4 + $0x2e4] sm:$0xf0]  ;;  %v1802_v42 = vld [vmem:[#allocation4 + $0x360] sm:$0xf]  ;;  %v1571_v44 = vor.u32 %v1989_v33, %v1570_v32  ;;  %v1666_v51 = vld [vmem:[#allocation4 + $0x250] sm:$0xf] }
  0x25   :  { %807 = vmatpush.bf16.msra.mxu2 %v1515_v3  ;;  %v70_v41 = vld [vmem:[%s2356_s1 + $0x8] sm:$0xff]  ;;  %v1562_v47 = vld [vmem:[#allocation4 + $0x180] sm:$0xf]  ;;  %v1739_v50 = vor.u32 %v2031_v40, %v1738_v39  ;;  %v1952_v52 = vld [vmem:[#allocation4 + $0x74] sm:$0xf]  ;;  %vm1319_vm7 = vcmask 523264  }
  0x26   :  { %819 = vmatpush.bf16.msra.mxu3 %v1587_v14  ;;  %v2047_v43 = vld [vmem:[#allocation4 + $0x364] sm:$0xf0]  ;;  %v197_v45 = vunpack.c.l.b16 %v70_v41  ;;  %v69_v49 = vld [vmem:[%s2356_s1] sm:$0xff]  ;;  %v1428_v53 = vld [vmem:[#allocation4 + $0x78] sm:$0xf0]  ;;  %v198_v61 = vunpack.c.h.b16 %v70_v41  ;;  %vm1336_vm8 = vcmask 80896  }
  0x27   :  { %782 = vmatpush.bf16.msra.mxu0 %v1379_v10  ;;  %v1987_v48 = vld [vmem:[#allocation4 + $0x184] sm:$0xf0]  ;;  %v195_v55 = vunpack.c.l.b16 %v69_v49  ;;  %v196_v56 = vunpack.c.h.b16 %v69_v49  ;;  %v1803_v57 = vor.u32 %v2047_v43, %v1802_v42  ;;  %v2013_v58 = vld [vmem:[#allocation4 + $0x254] sm:$0xf0]  ;;  %v1730_v59 = vld [vmem:[#allocation4 + $0x2d0] sm:$0xf]  ;;  %v1431_v3 = vor.u32 %v1952_v52, %v1428_v53 }
  0x28   :  { %795 = vmatpush.bf16.msra.mxu1 %v1443_v15  ;;  %v2244_v54 = vpack.c.b16 %v197_v45, %v197_v45  ;;  %v2029_v60 = vld [vmem:[#allocation4 + $0x2d4] sm:$0xf0]  ;;  %v1794_v62 = vld [vmem:[#allocation4 + $0x350] sm:$0xf]  ;;  %v1563_v0 = vor.u32 %v1987_v48, %v1562_v47  ;;  %v1667_v4 = vor.u32 %v2013_v58, %v1666_v51  ;;  %v1658_v6 = vld [vmem:[#allocation4 + $0x240] sm:$0xf]  ;;  %v2252_v13 = vpack.c.b16 %v198_v61, %v198_v61 }
  0x29   :  { %808 = vmatpush.bf16.msra.mxu2 %v1507_v16  ;;  %v2045_v63 = vld [vmem:[#allocation4 + $0x354] sm:$0xf0]  ;;  %v2247_v1 = vpack.c.b16 %v195_v55, %v195_v55  ;;  %v2249_v2 = vpack.c.b16 %v196_v56, %v196_v56  ;;  %v1731_v5 = vor.u32 %v2029_v60, %v1730_v59  ;;  %v1950_v7 = vld [vmem:[#allocation4 + $0x64] sm:$0xf]  ;;  %v1420_v8 = vld [vmem:[#allocation4 + $0x68] sm:$0xf0] }
  0x2a   :  { %820 = vmatpush.bf16.msra.mxu3 %v1579_v29  ;;  %v1795_v9 = vor.u32 %v2045_v63, %v1794_v62  ;;  %v2011_v10 = vld [vmem:[#allocation4 + $0x244] sm:$0xf0]  ;;  %v1722_v11 = vld [vmem:[#allocation4 + $0x2c0] sm:$0xf]  ;;  %v1423_v16 = vor.u32 %v1950_v7, %v1420_v8  ;;  %v1650_v19 = vld [vmem:[#allocation4 + $0x230] sm:$0xf] }
  0x2b   :  { %783 = vmatpush.bf16.msra.mxu0 %v1371_v26  ;;  %v2027_v12 = vld [vmem:[#allocation4 + $0x2c4] sm:$0xf0]  ;;  %v1786_v14 = vld [vmem:[#allocation4 + $0x340] sm:$0xf]  ;;  %v1659_v17 = vor.u32 %v2011_v10, %v1658_v6  ;;  %v1948_v20 = vld [vmem:[#allocation4 + $0x54] sm:$0xf] }
  0x2c   :  { %796 = vmatpush.bf16.msra.mxu1 %v1435_v30  ;;  %v2043_v15 = vld [vmem:[#allocation4 + $0x344] sm:$0xf0]  ;;  %v1723_v18 = vor.u32 %v2027_v12, %v1722_v11  ;;  %v1412_v21 = vld [vmem:[#allocation4 + $0x58] sm:$0xf0]  ;;  %v2009_v23 = vld [vmem:[#allocation4 + $0x234] sm:$0xf0] }
  0x2d   :  { %809 = vmatpush.bf16.msra.mxu2 %v1499_v31  ;;  %v1787_v22 = vor.u32 %v2043_v15, %v1786_v14  ;;  %v1714_v24 = vld [vmem:[#allocation4 + $0x2b0] sm:$0xf]  ;;  %v2025_v25 = vld [vmem:[#allocation4 + $0x2b4] sm:$0xf0]  ;;  %v1415_v28 = vor.u32 %v1948_v20, %v1412_v21  ;;  %v1651_v29 = vor.u32 %v2009_v23, %v1650_v19  ;;  %v1642_v31 = vld [vmem:[#allocation4 + $0x220] sm:$0xf] }
  0x2e   :  { %821 = vmatpush.bf16.msra.mxu3 %v1571_v44  ;;  %784 = vmatmul.bf16.vlgmr.msra.gmra.mxu0 %v2247_v1  ;;  %v1778_v26 = vld [vmem:[#allocation4 + $0x330] sm:$0xf]  ;;  %v2041_v27 = vld [vmem:[#allocation4 + $0x334] sm:$0xf0]  ;;  %v1715_v30 = vor.u32 %v2025_v25, %v1714_v24  ;;  %v1946_v32 = vld [vmem:[#allocation4 + $0x44] sm:$0xf] }
  0x2f   :  { %828 = vmatpush.bf16.msrb.mxu0 %v1683_v34  ;;  %797 = vmatmul.bf16.vlgmr.msra.gmra.mxu1 %v2249_v2  ;;  %v1404_v33 = vld [vmem:[#allocation4 + $0x48] sm:$0xf0]  ;;  %v1779_v34 = vor.u32 %v2041_v27, %v1778_v26  ;;  %v1706_v36 = vld [vmem:[#allocation4 + $0x2a0] sm:$0xf]  ;;  %v2023_v37 = vld [vmem:[#allocation4 + $0x2a4] sm:$0xf0] }
  0x30   :  { %841 = vmatpush.bf16.msrb.mxu1 %v1747_v35  ;;  %810 = vmatmul.bf16.vlgmr.msra.gmra.mxu2 %v2244_v54  ;;  %v2007_v35 = vld [vmem:[#allocation4 + $0x224] sm:$0xf0]  ;;  %v1407_v40 = vor.u32 %v1946_v32, %v1404_v33  ;;  %v1707_v42 = vor.u32 %v2023_v37, %v1706_v36  ;;  %v1634_v43 = vld [vmem:[#allocation4 + $0x210] sm:$0xf]  ;;  %v1944_v44 = vld [vmem:[#allocation4 + $0x34] sm:$0xf] }
  0x31   :  { %854 = vmatpush.bf16.msrb.mxu2 %v1811_v38  ;;  %v1770_v38 = vld [vmem:[#allocation4 + $0x320] sm:$0xf]  ;;  %v2039_v39 = vld [vmem:[#allocation4 + $0x324] sm:$0xf0]  ;;  %v1643_v41 = vor.u32 %v2007_v35, %v1642_v31  ;;  %v1396_v45 = vld [vmem:[#allocation4 + $0x38] sm:$0xf0] }
  0x32   :  { %822 = vmatpush.bf16.msra.mxu3 %v1563_v0  ;;  %v2005_v47 = vld [vmem:[#allocation4 + $0x214] sm:$0xf0]  ;;  %v1698_v48 = vld [vmem:[#allocation4 + $0x290] sm:$0xf]  ;;  %v1626_v52 = vld [vmem:[#allocation4 + $0x200] sm:$0xf] }
  0x33   :  { %829 = vmatpush.bf16.msrb.mxu0 %v1675_v46  ;;  %v1771_v46 = vor.u32 %v2039_v39, %v1770_v38  ;;  %v2021_v49 = vld [vmem:[#allocation4 + $0x294] sm:$0xf0]  ;;  %v2003_v53 = vld [vmem:[#allocation4 + $0x204] sm:$0xf0]  ;;  %v1690_v55 = vld [vmem:[#allocation4 + $0x280] sm:$0xf]  ;;  %v1635_v58 = vor.u32 %v2005_v47, %v1634_v43 }
  0x34   :  { %842 = vmatpush.bf16.msrb.mxu1 %v1739_v50  ;;  %v1762_v50 = vld [vmem:[#allocation4 + $0x310] sm:$0xf]  ;;  %v2037_v51 = vld [vmem:[#allocation4 + $0x314] sm:$0xf0]  ;;  %v2019_v56 = vld [vmem:[#allocation4 + $0x284] sm:$0xf0]  ;;  %v1699_v59 = vor.u32 %v2021_v49, %v1698_v48  ;;  %v1627_v15 = vor.u32 %v2003_v53, %v1626_v52 }
  0x35   :  { %855 = vmatpush.bf16.msrb.mxu2 %v1803_v57  ;;  %823 = vmatmul.bf16.vlgmr.msra.gmra.mxu3 %v2252_v13  ;;  %v1399_v57 = vor.u32 %v1944_v44, %v1396_v45  ;;  %v71_v60 = vld [vmem:[%s2356_s1 + $0x10] sm:$0xff]  ;;  %v1942_v61 = vld [vmem:[#allocation4 + $0x24] sm:$0xf]  ;;  %v1388_v62 = vld [vmem:[#allocation4 + $0x28] sm:$0xf0]  ;;  %v1763_v63 = vor.u32 %v2037_v51, %v1762_v50  ;;  %s1357_s23 = sshll.u32 %s2365_s10, 4  ;;  %s1358_s23 = int_to_ptr.hbm [resolvable:$true] %s1357_s23 }
  0x36   :  { %867 = vmatpush.bf16.msrb.mxu3 %v1431_v3  ;;  %v1754_v0 = vld [vmem:[#allocation4 + $0x300] sm:$0xf]  ;;  %v2035_v3 = vld [vmem:[#allocation4 + $0x304] sm:$0xf0]  ;;  %v1492_v6 = vld [vmem:[#allocation4 + $0xf8] sm:$0xf0]  ;;  %v1391_v10 = vor.u32 %v1942_v61, %v1388_v62  ;;  %v200_v11 = vunpack.c.h.b16 %v71_v60 }
  0x37   :  { %830 = vmatpush.bf16.msrb.mxu0 %v1667_v4  ;;  %v72_v4 = vld [vmem:[%s2356_s1 + $0x18] sm:$0xf]  ;;  %v1984_v7 = vld [vmem:[#allocation4 + $0x174] sm:$0xf]  ;;  %v1556_v8 = vld [vmem:[#allocation4 + $0x178] sm:$0xf0] }
  0x38   :  { %843 = vmatpush.bf16.msrb.mxu1 %v1731_v5  ;;  %v1968_v5 = vld [vmem:[#allocation4 + $0xf4] sm:$0xf]  ;;  %v1620_v14 = vld [vmem:[#allocation4 + $0x1f8] sm:$0xf0]  ;;  %v1966_v23 = vld [vmem:[#allocation4 + $0xe4] sm:$0xf] }
  0x39   :  { %856 = vmatpush.bf16.msrb.mxu2 %v1795_v9  ;;  %v199_v9 = vunpack.c.l.b16 %v71_v60  ;;  %v2000_v12 = vld [vmem:[#allocation4 + $0x1f4] sm:$0xf]  ;;  %v1495_v19 = vor.u32 %v1968_v5, %v1492_v6  ;;  %v1380_v21 = vld [vmem:[#allocation4 + $0x18] sm:$0xf0]  ;;  %v1484_v24 = vld [vmem:[#allocation4 + $0xe8] sm:$0xf0] }
  0x3a   :  { %868 = vmatpush.bf16.msrb.mxu3 %v1423_v16  ;;  %v1691_v16 = vor.u32 %v2019_v56, %v1690_v55  ;;  %v1940_v20 = vld [vmem:[#allocation4 + $0x14] sm:$0xf]  ;;  %v1982_v25 = vld [vmem:[#allocation4 + $0x164] sm:$0xf]  ;;  %v1623_v26 = vor.u32 %v2000_v12, %v1620_v14  ;;  %v1612_v31 = vld [vmem:[#allocation4 + $0x1e8] sm:$0xf0]  ;;  %v1487_v35 = vor.u32 %v1966_v23, %v1484_v24 }
  0x3b   :  { %831 = vmatpush.bf16.msrb.mxu0 %v1659_v17  ;;  %v201_v17 = vunpack.c.l.b16 %v72_v4  ;;  %v2262_v27 = vpack.c.b16 %v199_v9, %v199_v9  ;;  %v1383_v33 = vor.u32 %v1940_v20, %v1380_v21  ;;  %v1476_v36 = vld [vmem:[#allocation4 + $0xd8] sm:$0xf0]  ;;  %v1938_v37 = vld [vmem:[#allocation4 + $0x4] sm:$0xf]  ;;  %v1372_v38 = vld [vmem:[#allocation4 + $0x8] sm:$0xf0] }
  0x3c   :  { %844 = vmatpush.bf16.msrb.mxu1 %v1723_v18  ;;  %v1755_v18 = vor.u32 %v2035_v3, %v1754_v0  ;;  %v1540_v44 = vld [vmem:[#allocation4 + $0x158] sm:$0xf0]  ;;  %v1996_v45 = vld [vmem:[#allocation4 + $0x1d4] sm:$0xf]  ;;  %v1375_v47 = vor.u32 %v1938_v37, %v1372_v38  ;;  %v1962_v49 = vld [vmem:[#allocation4 + $0xc4] sm:$0xf] }
  0x3d   :  { %857 = vmatpush.bf16.msrb.mxu2 %v1787_v22  ;;  %v1559_v22 = vor.u32 %v1984_v7, %v1556_v8  ;;  %v2266_v32 = vpack.c.b16 %v201_v17, %v201_v17  ;;  %v1468_v50 = vld [vmem:[#allocation4 + $0xc8] sm:$0xf0]  ;;  %v1978_v53 = vld [vmem:[#allocation4 + $0x144] sm:$0xf]  ;;  %v1960_v61 = vld [vmem:[#allocation4 + $0xb4] sm:$0xf] }
  0x3e   :  { %869 = vmatpush.bf16.msrb.mxu3 %v1415_v28  ;;  %v1548_v28 = vld [vmem:[#allocation4 + $0x168] sm:$0xf0]  ;;  %v2014_v55 = vld [vmem:[#allocation4 + $0x264] sm:$0xf]  ;;  %v1460_v62 = vld [vmem:[#allocation4 + $0xb8] sm:$0xf0] }
  0x3f   :  { %832 = vmatpush.bf16.msrb.mxu0 %v1651_v29  ;;  %v2264_v29 = vpack.c.b16 %v200_v11, %v200_v11  ;;  %v1551_v39 = vor.u32 %v1982_v25, %v1548_v28  ;;  %v1676_v56 = vld [vmem:[#allocation4 + $0x268] sm:$0xf0]  ;;  %v1976_v0 = vld [vmem:[#allocation4 + $0x134] sm:$0xf]  ;;  %v1668_v5 = vld [vmem:[#allocation4 + $0x258] sm:$0xf0]  ;;  %v1463_v11 = vor.u32 %v1960_v61, %v1460_v62 }
  0x40   :  { %845 = vmatpush.bf16.msrb.mxu1 %v1715_v30  ;;  %v1998_v30 = vld [vmem:[#allocation4 + $0x1e4] sm:$0xf]  ;;  %v1596_v60 = vld [vmem:[#allocation4 + $0x1c8] sm:$0xf0]  ;;  %v1679_v3 = vor.u32 %v2014_v55, %v1676_v56  ;;  %v2012_v4 = vld [vmem:[#allocation4 + $0x254] sm:$0xf] }
  0x41   :  { %858 = vmatpush.bf16.msrb.mxu2 %v1779_v34  ;;  %v1964_v34 = vld [vmem:[#allocation4 + $0xd4] sm:$0xf]  ;;  %v1615_v43 = vor.u32 %v1998_v30, %v1612_v31  ;;  %v1524_v8 = vld [vmem:[#allocation4 + $0x138] sm:$0xf0]  ;;  %v1958_v12 = vld [vmem:[#allocation4 + $0xa4] sm:$0xf] }
  0x42   :  { %870 = vmatpush.bf16.msrb.mxu3 %v1407_v40  ;;  %v1980_v40 = vld [vmem:[#allocation4 + $0x154] sm:$0xf]  ;;  %v1479_v48 = vor.u32 %v1964_v34, %v1476_v36  ;;  %v1452_v14 = vld [vmem:[#allocation4 + $0xa8] sm:$0xf0]  ;;  %v1974_v17 = vld [vmem:[#allocation4 + $0x124] sm:$0xf] }
  0x43   :  { %833 = vmatpush.bf16.msrb.mxu0 %v1643_v41  ;;  %v2016_v41 = vld [vmem:[#allocation4 + $0x274] sm:$0xf]  ;;  %v1543_v52 = vor.u32 %v1980_v40, %v1540_v44  ;;  %v1516_v21 = vld [vmem:[#allocation4 + $0x128] sm:$0xf0]  ;;  %v1455_v24 = vor.u32 %v1958_v12, %v1452_v14  ;;  %v1444_v25 = vld [vmem:[#allocation4 + $0x98] sm:$0xf0] }
  0x44   :  { %846 = vmatpush.bf16.msrb.mxu1 %v1707_v42  ;;  %v1684_v42 = vld [vmem:[#allocation4 + $0x278] sm:$0xf0]  ;;  %v1992_v9 = vld [vmem:[#allocation4 + $0x1b4] sm:$0xf]  ;;  %v1580_v23 = vld [vmem:[#allocation4 + $0x1a8] sm:$0xf0]  ;;  %v1519_v28 = vor.u32 %v1974_v17, %v1516_v21 }
  0x45   :  { %859 = vmatpush.bf16.msrb.mxu2 %v1771_v46  ;;  %v1604_v46 = vld [vmem:[#allocation4 + $0x1d8] sm:$0xf0]  ;;  %v1687_v51 = vor.u32 %v2016_v41, %v1684_v42  ;;  %v1972_v30 = vld [vmem:[#allocation4 + $0x114] sm:$0xf]  ;;  %v1436_v40 = vld [vmem:[#allocation4 + $0x88] sm:$0xf0] }
  0x46   :  { %871 = vmatpush.bf16.msrb.mxu3 %v1399_v57  ;;  %v1607_v57 = vor.u32 %v1996_v45, %v1604_v46  ;;  %v2008_v31 = vld [vmem:[#allocation4 + $0x234] sm:$0xf]  ;;  %v1572_v37 = vld [vmem:[#allocation4 + $0x198] sm:$0xf0]  ;;  %v1970_v41 = vld [vmem:[#allocation4 + $0x104] sm:$0xf] }
  0x47   :  { %834 = vmatpush.bf16.msrb.mxu0 %v1635_v58  ;;  %v1532_v58 = vld [vmem:[#allocation4 + $0x148] sm:$0xf0]  ;;  %v1988_v36 = vld [vmem:[#allocation4 + $0x194] sm:$0xf]  ;;  %v2006_v45 = vld [vmem:[#allocation4 + $0x224] sm:$0xf] }
  0x48   :  { %847 = vmatpush.bf16.msrb.mxu1 %v1699_v59  ;;  %v1994_v59 = vld [vmem:[#allocation4 + $0x1c4] sm:$0xf]  ;;  %v1535_v6 = vor.u32 %v1978_v53, %v1532_v58  ;;  %v1500_v44 = vld [vmem:[#allocation4 + $0x108] sm:$0xf0]  ;;  %v1732_v12 = vld [vmem:[#allocation4 + $0x2d8] sm:$0xf0] }
  0x49   :  { %860 = vmatpush.bf16.msrb.mxu2 %v1763_v63  ;;  %v1471_v63 = vor.u32 %v1962_v49, %v1468_v50  ;;  %v1599_v7 = vor.u32 %v1994_v59, %v1596_v60  ;;  %v1644_v46 = vld [vmem:[#allocation4 + $0x228] sm:$0xf0]  ;;  %v1748_v49 = vld [vmem:[#allocation4 + $0x2f8] sm:$0xf0]  ;;  %v2048_v50 = vld [vmem:[#allocation4 + $0x374] sm:$0xf] }
  0x4a   :  { %872 = vmatpush.bf16.msrb.mxu3 %v1391_v10  ;;  %v1588_v10 = vld [vmem:[#allocation4 + $0x1b8] sm:$0xf0]  ;;  %v1564_v53 = vld [vmem:[#allocation4 + $0x188] sm:$0xf0]  ;;  %v1647_v56 = vor.u32 %v2006_v45, %v1644_v46  ;;  %v2004_v59 = vld [vmem:[#allocation4 + $0x214] sm:$0xf] }
  0x4b   :  { %835 = vmatpush.bf16.msrb.mxu0 %v1627_v15  ;;  %v1671_v15 = vor.u32 %v2012_v4, %v1668_v5  ;;  %v1591_v20 = vor.u32 %v1992_v9, %v1588_v10  ;;  %v1636_v60 = vld [vmem:[#allocation4 + $0x218] sm:$0xf0]  ;;  %v2030_v62 = vld [vmem:[#allocation4 + $0x2e4] sm:$0xf]  ;;  %v1804_v4 = vld [vmem:[#allocation4 + $0x368] sm:$0xf0] }
  0x4c   :  { %848 = vmatpush.bf16.msrb.mxu1 %v1691_v16  ;;  %v1527_v16 = vor.u32 %v1976_v0, %v1524_v8  ;;  %v1639_v5 = vor.u32 %v2004_v59, %v1636_v60  ;;  %v1628_v8 = vld [vmem:[#allocation4 + $0x208] sm:$0xf0]  ;;  %v2057_v9 = vld [vmem:[#allocation7 + $0x38] sm:$0xff]  ;;  %v2044_v14 = vld [vmem:[#allocation4 + $0x354] sm:$0xf] }
  0x4d   :  { %861 = vmatpush.bf16.msrb.mxu2 %v1755_v18  ;;  %v2010_v18 = vld [vmem:[#allocation4 + $0x244] sm:$0xf]  ;;  %s968_s14 = smul.u32 2246822507, %s2355_s0 }
  0x4e   :  { %836 = vmatmul.bf16.vlgmr.msrb.gmra.mxu0 %v2262_v27  ;;  %873 = vmatpush.bf16.msrb.mxu3 %v1383_v33  ;;  %v1652_v33 = vld [vmem:[#allocation4 + $0x238] sm:$0xf0]  ;;  %v2042_v21 = vld [vmem:[#allocation4 + $0x344] sm:$0xf] }
  0x4f   :  { %880 = vmatpush.bf16.msra.mxu0 %v1495_v19  ;;  %849 = vmatmul.bf16.vlgmr.msrb.gmra.mxu1 %v2264_v29  ;;  %v1660_v19 = vld [vmem:[#allocation4 + $0x248] sm:$0xf0]  ;;  %v1655_v42 = vor.u32 %v2008_v31, %v1652_v33  ;;  %v2038_v31 = vld [vmem:[#allocation4 + $0x324] sm:$0xf]  ;;  %s2286_s15 = sxor.u32 3266489909, %s968_s14 }
  0x50   :  { %893 = vmatpush.bf16.msra.mxu1 %v1559_v22  ;;  %862 = vmatmul.bf16.vlgmr.msrb.gmra.mxu2 %v2266_v32  ;;  %v1990_v22 = vld [vmem:[#allocation4 + $0x1a4] sm:$0xf]  ;;  %v1772_v33 = vld [vmem:[#allocation4 + $0x328] sm:$0xf0]  ;;  %s972_s16 = sxor.u32 668265263, %s2286_s15 }
  0x51   :  { %906 = vmatpush.bf16.msra.mxu2 %v1623_v26  ;;  %v1663_v26 = vor.u32 %v2010_v18, %v1660_v19  ;;  %v1583_v34 = vor.u32 %v1990_v22, %v1580_v23  ;;  %v2026_v19 = vld [vmem:[#allocation4 + $0x2c4] sm:$0xf]  ;;  %v1788_v22 = vld [vmem:[#allocation4 + $0x348] sm:$0xf0]  ;;  %s1165_s27 = sxor.u32 1336530526, %s2286_s15 }
  0x52   :  { %874 = vmatpush.bf16.msrb.mxu3 %v1375_v47  ;;  %v1575_v47 = vor.u32 %v1988_v36, %v1572_v37  ;;  %v1791_v23 = vor.u32 %v2042_v21, %v1788_v22  ;;  %v2020_v36 = vld [vmem:[#allocation4 + $0x294] sm:$0xf]  ;;  %v1700_v37 = vld [vmem:[#allocation4 + $0x298] sm:$0xf0] }
  0x53   :  { %881 = vmatpush.bf16.msra.mxu0 %v1487_v35  ;;  %v1508_v35 = vld [vmem:[#allocation4 + $0x118] sm:$0xf0] }
  0x54   :  { %894 = vmatpush.bf16.msra.mxu1 %v1551_v39  ;;  %v1954_v39 = vld [vmem:[#allocation4 + $0x84] sm:$0xf] }
  0x55   :  { %907 = vmatpush.bf16.msra.mxu2 %v1615_v43  ;;  %875 = vmatmul.bf16.vlgmr.msrb.gmra.mxu3 %v2247_v1  ;;  %v1956_v1 = vld [vmem:[#allocation4 + $0x94] sm:$0xf]  ;;  %v1511_v43 = vor.u32 %v1972_v30, %v1508_v35  ;;  %v1439_v55 = vor.u32 %v1954_v39, %v1436_v40  ;;  %v1708_v30 = vld [vmem:[#allocation4 + $0x2a8] sm:$0xf0]  ;;  %v1775_v35 = vor.u32 %v2038_v31, %v1772_v33  ;;  %v1764_v39 = vld [vmem:[#allocation4 + $0x318] sm:$0xf0] }
  0x56   :  { %919 = vmatpush.bf16.msra.mxu3 %v1687_v51  ;;  %v1447_v38 = vor.u32 %v1956_v1, %v1444_v25  ;;  %v1812_v51 = vld [vmem:[#allocation4 + $0x378] sm:$0xf0] }
  0x57   :  { %882 = vmatpush.bf16.msra.mxu0 %v1479_v48  ;;  %v2032_v48 = vld [vmem:[#allocation4 + $0x2f4] sm:$0xf]  ;;  %v1815_v61 = vor.u32 %v2048_v50, %v1812_v51  ;;  %v1716_v1 = vld [vmem:[#allocation4 + $0x2b8] sm:$0xf0]  ;;  %v960_v50 = vlaneseq }
  0x58   :  { %895 = vmatpush.bf16.msra.mxu1 %v1543_v52  ;;  %v1986_v52 = vld [vmem:[#allocation4 + $0x184] sm:$0xf]  ;;  %v1751_v58 = vor.u32 %v2032_v48, %v1748_v49  ;;  %v1780_v25 = vld [vmem:[#allocation4 + $0x338] sm:$0xf0]  ;;  %v2055_v48 = vld [vmem:[#allocation7 + $0x28] sm:$0xff] }
  0x59   :  { %908 = vmatpush.bf16.msra.mxu2 %v1607_v57  ;;  %v1503_v57 = vor.u32 %v1970_v41, %v1500_v44  ;;  %v1567_v0 = vor.u32 %v1986_v52, %v1564_v53  ;;  %v2018_v41 = vld [vmem:[#allocation4 + $0x284] sm:$0xf]  ;;  %v1756_v44 = vld [vmem:[#allocation4 + $0x308] sm:$0xf0]  ;;  %v2278_v51 = vshrl.u32 %v960_v50, 7  ;;  %v2053_v52 = vld [vmem:[#allocation7 + $0x18] sm:$0xff] }
  0x5a   :  { %920 = vmatpush.bf16.msra.mxu3 %v1679_v3  ;;  %v2046_v3 = vld [vmem:[#allocation4 + $0x364] sm:$0xf]  ;;  %v2283_v53 = vand.u32 127, %v960_v50 }
  0x5b   :  { %883 = vmatpush.bf16.msra.mxu0 %v1471_v63  ;;  %v1740_v63 = vld [vmem:[#allocation4 + $0x2e8] sm:$0xf0]  ;;  %v1807_v10 = vor.u32 %v2046_v3, %v1804_v4  ;;  %v2054_v49 = vld [vmem:[#allocation7 + $0x20] sm:$0xff] }
  0x5c   :  { %896 = vmatpush.bf16.msra.mxu1 %v1535_v6  ;;  %v1743_v6 = vor.u32 %v2030_v62, %v1740_v63  ;;  %v2051_v62 = vld [vmem:[#allocation7 + $0x8] sm:$0xff]  ;;  %v2050_v4 = vld [vmem:[#allocation7] sm:$0xff] }
  0x5d   :  { %909 = vmatpush.bf16.msra.mxu2 %v1599_v7  ;;  %v2002_v7 = vld [vmem:[#allocation4 + $0x204] sm:$0xf] }
  0x5e   :  { %921 = vmatpush.bf16.msra.mxu3 %v1671_v15  ;;  %v1796_v15 = vld [vmem:[#allocation4 + $0x358] sm:$0xf0]  ;;  %v2058_v50 = vld [vmem:[#allocation7 + $0x40] sm:$0xff] }
  0x5f   :  { %884 = vmatpush.bf16.msra.mxu0 %v1463_v11  ;;  %v2028_v11 = vld [vmem:[#allocation4 + $0x2d4] sm:$0xf]  ;;  %v1799_v18 = vor.u32 %v2044_v14, %v1796_v15 }
  0x60   :  { %897 = vmatpush.bf16.msra.mxu1 %v1527_v16  ;;  %v1631_v16 = vor.u32 %v2002_v7, %v1628_v8  ;;  %v1735_v17 = vor.u32 %v2028_v11, %v1732_v12 }
  0x61   :  { %910 = vmatpush.bf16.msra.mxu2 %v1591_v20  ;;  %v1724_v20 = vld [vmem:[#allocation4 + $0x2c8] sm:$0xf0] }
  0x62   :  { %922 = vmatpush.bf16.msra.mxu3 %v1663_v26 }
  0x63   :  { %885 = vmatpush.bf16.msra.mxu0 %v1455_v24  ;;  %v2024_v24 = vld [vmem:[#allocation4 + $0x2b4] sm:$0xf] }
  0x64   :  { %898 = vmatpush.bf16.msra.mxu1 %v1519_v28  ;;  %v1719_v26 = vor.u32 %v2024_v24, %v1716_v1  ;;  %v2022_v28 = vld [vmem:[#allocation4 + $0x2a4] sm:$0xf] }
  0x65   :  { %911 = vmatpush.bf16.msra.mxu2 %v1583_v34  ;;  %v1711_v34 = vor.u32 %v2022_v28, %v1708_v30 }
  0x66   :  { %923 = vmatpush.bf16.msra.mxu3 %v1655_v42  ;;  %v1692_v42 = vld [vmem:[#allocation4 + $0x288] sm:$0xf0] }
  0x67   :  { %886 = vmatpush.bf16.msra.mxu0 %v1447_v38  ;;  %v2036_v38 = vld [vmem:[#allocation4 + $0x314] sm:$0xf]  ;;  %v1695_v45 = vor.u32 %v2018_v41, %v1692_v42 }
  0x68   :  { %899 = vmatpush.bf16.msra.mxu1 %v1511_v43  ;;  %v1767_v40 = vor.u32 %v2036_v38, %v1764_v39  ;;  %v2034_v43 = vld [vmem:[#allocation4 + $0x304] sm:$0xf] }
  0x69   :  { %912 = vmatpush.bf16.msra.mxu2 %v1575_v47  ;;  %v1759_v46 = vor.u32 %v2034_v43, %v1756_v44  ;;  %v2056_v47 = vld [vmem:[#allocation7 + $0x30] sm:$0xff] }
  0x6a   :  { %924 = vmatpush.bf16.msra.mxu3 %v1647_v56  ;;  %v975_v56 = vstv %s972_s16  ;;  %v2060_v44 = vld [vmem:[#allocation7 + $0x50] sm:$0xff] }
  0x6b   :  { %887 = vmatpush.bf16.msra.mxu0 %v1439_v55 }
  0x6c   :  { %900 = vmatpush.bf16.msra.mxu1 %v1503_v57 }
  0x6d   :  { %913 = vmatpush.bf16.msra.mxu2 %v1567_v0  ;;  %v2293_v0 = vld [vmem:[%s2358_s3] sm:$0x3] }
  0x6e   :  { %888 = vmatmul.bf16.vlgmr.msra.gmra.mxu0 %v2249_v2  ;;  %925 = vmatpush.bf16.msra.mxu3 %v1639_v5  ;;  %v1727_v2 = vor.u32 %v2026_v19, %v1724_v20  ;;  %v187_v5 = vperm.slane %v2293_v0, 0 }
  0x6f   :  { %932 = vmatpush.bf16.msrb.mxu0 %v1751_v58  ;;  %901 = vmatmul.bf16.vlgmr.msra.gmra.mxu1 %v2244_v54  ;;  %v2040_v54 = vld [vmem:[#allocation4 + $0x334] sm:$0xf] }
  0x70   :  { %945 = vmatpush.bf16.msrb.mxu1 %v1815_v61  ;;  %914 = vmatmul.bf16.vlgmr.msra.gmra.mxu2 %v2252_v13  ;;  %v1783_v13 = vor.u32 %v2040_v54, %v1780_v25  ;;  %v2052_v58 = vld [vmem:[#allocation7 + $0x10] sm:$0xff] }
  0x71   :  { %1136 = vmatpush.bf16.msrb.mxu2 %v2057_v9  ;;  %v2064_v54 = vld [vmem:[#allocation7 + $0x70] sm:$0xff] }
  0x72   :  { %926 = vmatpush.bf16.msra.mxu3 %v1631_v16 }
  0x73   :  { %933 = vmatpush.bf16.msrb.mxu0 %v1743_v6 }
  0x74   :  { %946 = vmatpush.bf16.msrb.mxu1 %v1807_v10 }
  0x75   :  { %927 = vmatmul.bf16.vlgmr.msra.gmra.mxu3 %v2262_v27  ;;  %v1703_v27 = vor.u32 %v2020_v36, %v1700_v37  ;;  %1137 = vmatpush.bf16.msrb.mxu2 %v2056_v47  ;;  %v2062_v36 = vld [vmem:[#allocation7 + $0x60] sm:$0xff]  ;;  %v2059_v47 = vld [vmem:[#allocation7 + $0x48] sm:$0xff] }
  0x77   :  { %934 = vmatpush.bf16.msrb.mxu0 %v1735_v17 }
  0x78   :  { %947 = vmatpush.bf16.msrb.mxu1 %v1799_v18 }
  0x79   :  { %1138 = vmatpush.bf16.msrb.mxu2 %v2055_v48 }
  0x7b   :  { %935 = vmatpush.bf16.msrb.mxu0 %v1727_v2  ;;  %v2065_v2 = vld [vmem:[#allocation7 + $0x78] sm:$0xff] }
  0x7c   :  { %948 = vmatpush.bf16.msrb.mxu1 %v1791_v23  ;;  %1149 = vmatpush.bf16.msrb.mxu3 %v2065_v2  ;;  %v2069_v2 = vld [vmem:[%s2361_s6 + $0x18] sm:$0xff] }
  0x7d   :  { %1139 = vmatpush.bf16.msrb.mxu2 %v2054_v49 }
  0x7f   :  { %936 = vmatpush.bf16.msrb.mxu0 %v1719_v26 }
  0x80   :  { %949 = vmatpush.bf16.msrb.mxu1 %v1783_v13  ;;  %1150 = vmatpush.bf16.msrb.mxu3 %v2064_v54  ;;  %v2063_v13 = vld [vmem:[#allocation7 + $0x68] sm:$0xff] }
  0x81   :  { %1140 = vmatpush.bf16.msrb.mxu2 %v2053_v52 }
  0x83   :  { %937 = vmatpush.bf16.msrb.mxu0 %v1711_v34  ;;  %v964_v34 = vadd.s32 128, %v2283_v53 }
  0x84   :  { %950 = vmatpush.bf16.msrb.mxu1 %v1775_v35  ;;  %1151 = vmatpush.bf16.msrb.mxu3 %v2063_v13  ;;  %v1167_v13 = vstv %s1165_s27 }
  0x85   :  { %1141 = vmatpush.bf16.msrb.mxu2 %v2052_v58 }
  0x87   :  { %938 = vmatpush.bf16.msrb.mxu0 %v1703_v27  ;;  %v2061_v27 = vld [vmem:[#allocation7 + $0x58] sm:$0xff] }
  0x88   :  { %951 = vmatpush.bf16.msrb.mxu1 %v1767_v40  ;;  %1152 = vmatpush.bf16.msrb.mxu3 %v2062_v36  ;;  %v2077_v36 = vld [vmem:[%s2363_s8 + $0x18] sm:$0xff] }
  0x89   :  { %1142 = vmatpush.bf16.msrb.mxu2 %v2051_v62 }
  0x8b   :  { %939 = vmatpush.bf16.msrb.mxu0 %v1695_v45 }
  0x8c   :  { %952 = vmatpush.bf16.msrb.mxu1 %v1759_v46  ;;  %1153 = vmatpush.bf16.msrb.mxu3 %v2061_v27 }
  0x8d   :  { %1143 = vmatpush.bf16.msrb.mxu2 %v2050_v4 }
  0x8e   :  { %940 = vmatmul.bf16.vlgmr.msrb.gmra.mxu0 %v2264_v29  ;;  %v965_v29 = vmul.u32 256, %v2278_v51 }
  0x8f   :  { %953 = vmatmul.bf16.vlgmr.msrb.gmra.mxu1 %v2266_v32 }
  0x90   :  { %v966_v32 = vadd.s32 %v965_v29, %v2283_v53  ;;  %v967_v40 = vadd.s32 %v965_v29, %v964_v34  ;;  %1154 = vmatpush.bf16.msrb.mxu3 %v2060_v44  ;;  %v2066_v34 = vld [vmem:[%s2361_s6] sm:$0xff]  ;;  %1327 = vmatpush.bf16.msra.mxu1 %v2077_v36 }
  0x92   :  { %v973_v55 = vmul.u32 2654435769, %v966_v32  ;;  %v974_v41 = vmul.u32 2654435769, %v967_v40  ;;  %v188_v32 = vperm.slane %v2293_v0, 1 }
  0x94   :  { %v976_v57 = vadd.s32 %v975_v56, %v973_v55  ;;  %v977_v43 = vadd.s32 %v975_v56, %v974_v41  ;;  %1155 = vmatpush.bf16.msrb.mxu3 %v2059_v47  ;;  %v2085_v41 = vld [vmem:[%s2360_s5] ss:$0 sm:$0xff] }
  0x96   :  { %v978_v60 = vshrl.u32 %v976_v57, 16  ;;  %v979_v45 = vshrl.u32 %v977_v43, 16 }
  0x98   :  { %v980_v3 = vxor.u32 %v978_v60, %v976_v57  ;;  %v981_v49 = vxor.u32 %v979_v45, %v977_v43  ;;  %1156 = vmatpush.bf16.msrb.mxu3 %v2058_v50 }
  0x9a   :  { %v982_v7 = vmul.u32 2146121005, %v980_v3  ;;  %v983_v52 = vmul.u32 2146121005, %v981_v49 }
  0x9c   :  { %v984_v12 = vshrl.u32 %v982_v7, 15  ;;  %v985_v58 = vshrl.u32 %v983_v52, 15 }
  0x9e   :  { %v986_v15 = vxor.u32 %v984_v12, %v982_v7  ;;  %v987_v56 = vxor.u32 %v985_v58, %v983_v52  ;;  %v1264_v52 = vmul.u32 64, %v2278_v51 }
  0xa0   :  { %v988_v18 = vmul.u32 2221713035, %v986_v15 }
  0xa2   :  { %v990_v20 = vshrl.u32 %v988_v18, 16 }
  0xa4   :  { %v992_v24 = vxor.u32 %v990_v20, %v988_v18  ;;  %v2072_v20 = vld [vmem:[%s2361_s6 + $0x30] sm:$0xff] }
  0xa6   :  { %v994_v25 = vshrl.u32 %v992_v24, 1 }
  0xa8   :  { %vm996_vm0 = vcmp.ge.s32.totalorder %v994_v25, 429496729 }
  0xa9   :  { %vm1880_vm1 = vmpackc.low %vm996_vm0, %vm996_vm0 }
  0xab   :  { %v785_v59 = vpop.f32.mrf.mxu0 }
  0xac   :  { %v798_v61 = vpop.f32.mrf.mxu1  ;;  %v786_v10 = vadd.f32 %v785_v59, %v187_v5 }
  0xae   :  { %v799_v14 = vadd.f32 %v798_v61, %v786_v10 }
  0xb3   :  { %v811_v63 = vpop.f32.mrf.mxu2  ;;  %v787_v6 = vpop.f32.mrf.mxu0 }
  0xb4   :  { %v800_v8 = vpop.f32.mrf.mxu1  ;;  %v812_v17 = vadd.f32 %v811_v63, %v799_v14  ;;  %v989_v63 = vmul.u32 2221713035, %v987_v56  ;;  %v2074_v56 = vld [vmem:[%s2363_s8] sm:$0xff] }
  0xb6   :  { %v991_v5 = vshrl.u32 %v989_v63, 16 }
  0xb8   :  { %v824_v9 = vpop.f32.mrf.mxu3  ;;  %v993_v7 = vxor.u32 %v991_v5, %v989_v63 }
  0xb9   :  { %v825_v19 = vadd.f32 %v824_v9, %v812_v17 }
  0xba   :  { %v995_v0 = vshrl.u32 %v993_v7, 1 }
  0xbb   :  { %v813_v11 = vpop.f32.mrf.mxu2 }
  0xbc   :  { %vm997_vm2 = vcmp.ge.s32.totalorder %v995_v0, 429496729 }
  0xbd   :  { %vm1883_vm3 = vmpackc.low %vm997_vm2, %vm997_vm2 }
  0xc0   :  { %v826_v16 = vpop.f32.mrf.mxu3 }
  0xcb   :  { %v837_v21 = vpop.f32.mrf.mxu0 }
  0xcc   :  { %v850_v22 = vpop.f32.mrf.mxu1  ;;  %v838_v23 = vadd.f32 %v837_v21, %v825_v19  ;;  %v2073_v19 = vld [vmem:[%s2361_s6 + $0x38] sm:$0xff]  ;;  %v2071_v21 = vld [vmem:[%s2361_s6 + $0x28] sm:$0xff] }
  0xcd   :  { %1250 = vmatpush.bf16.msra.mxu0 %v2073_v19 }
  0xce   :  { %v851_v1 = vadd.f32 %v850_v22, %v838_v23  ;;  %v2070_v22 = vld [vmem:[%s2361_s6 + $0x20] sm:$0xff]  ;;  %v2068_v23 = vld [vmem:[%s2361_s6 + $0x10] sm:$0xff] }
  0xd1   :  { %1251 = vmatpush.bf16.msra.mxu0 %v2072_v20 }
  0xd3   :  { %v863_v26 = vpop.f32.mrf.mxu2  ;;  %v839_v30 = vpop.f32.mrf.mxu0 }
  0xd4   :  { %v864_v28 = vadd.f32 %v863_v26, %v851_v1  ;;  %v852_v31 = vpop.f32.mrf.mxu1  ;;  %v1163_v1 = vmul.u32 128, %v2278_v51 }
  0xd5   :  { %1252 = vmatpush.bf16.msra.mxu0 %v2071_v21  ;;  %v2067_v31 = vld [vmem:[%s2361_s6 + $0x8] sm:$0xff]  ;;  %s1266_s6 = sxor.u32 2004795789, %s2286_s15 }
  0xd6   :  { %v958_v33 = vmax.f32 %v864_v28, 0.0  ;;  %v1164_v25 = vadd.s32 %v1163_v1, %v2283_v53 }
  0xd8   :  { %v998_v35 = vmul.f32 1.25, %v958_v33  ;;  %v876_v38 = vpop.f32.mrf.mxu3  ;;  %v1166_v26 = vmul.u32 2654435769, %v1164_v25 }
  0xd9   :  { %v877_v59 = vadd.f32 %v876_v38, %v188_v32  ;;  %1253 = vmatpush.bf16.msra.mxu0 %v2070_v22  ;;  %v2076_v38 = vld [vmem:[%s2363_s8 + $0x10] sm:$0xff]  ;;  %v1265_v32 = vadd.s32 %v1264_v52, %v2283_v53 }
  0xda   :  { %v1881_v37 = vpack.c.bf16 %v998_v35, %v998_v35  ;;  %v1168_v28 = vadd.s32 %v1167_v13, %v1166_v26  ;;  %1328 = vmatpush.bf16.msra.mxu1 %v2076_v38 }
  0xdb   :  { %v865_v39 = vpop.f32.mrf.mxu2 }
  0xdc   :  { %1882 = vmatmul.msk.bf16.vlgmr.msrb.gmra.mxu2 %vm1880_vm1, %v1881_v37  ;;  %v1169_v30 = vshrl.u32 %v1168_v28, 16 }
  0xdd   :  { %1254 = vmatpush.bf16.msra.mxu0 %v2069_v2 }
  0xde   :  { %v1170_v33 = vxor.u32 %v1169_v30, %v1168_v28 }
  0xe0   :  { %v878_v42 = vpop.f32.mrf.mxu3  ;;  %v1171_v35 = vmul.u32 2146121005, %v1170_v33 }
  0xe1   :  { %1255 = vmatpush.bf16.msra.mxu0 %v2068_v23 }
  0xe2   :  { %v1172_v37 = vshrl.u32 %v1171_v35, 15 }
  0xe4   :  { %v1173_v39 = vxor.u32 %v1172_v37, %v1171_v35 }
  0xe5   :  { %1256 = vmatpush.bf16.msra.mxu0 %v2067_v31 }
  0xe6   :  { %v1174_v27 = vmul.u32 2221713035, %v1173_v39 }
  0xe8   :  { %v1175_v40 = vshrl.u32 %v1174_v27, 16 }
  0xe9   :  { %1257 = vmatpush.bf16.msra.mxu0 %v2066_v34 }
  0xea   :  { %v1176_v42 = vxor.u32 %v1175_v40, %v1174_v27 }
  0xeb   :  { %v889_v46 = vpop.f32.mrf.mxu0 }
  0xec   :  { %v902_v48 = vpop.f32.mrf.mxu1  ;;  %v890_v61 = vadd.f32 %v889_v46, %v877_v59  ;;  %v1177_v44 = vshrl.u32 %v1176_v42, 1  ;;  %v2075_v59 = vld [vmem:[%s2363_s8 + $0x8] sm:$0xff] }
  0xed   :  { %1329 = vmatpush.bf16.msra.mxu1 %v2075_v59 }
  0xee   :  { %v903_v3 = vadd.f32 %v902_v48, %v890_v61  ;;  %vm1178_vm4 = vcmp.ge.s32.totalorder %v1177_v44, 429496729 }
  0xef   :  { %vm1918_vm5 = vmpackc.low %vm1178_vm4, %vm1178_vm4 }
  0xf1   :  { %1330 = vmatpush.bf16.msra.mxu1 %v2074_v56 }
  0xf3   :  { %v891_v55 = vpop.f32.mrf.mxu0  ;;  %v915_v29 = vpop.f32.mrf.mxu2 }
  0xf4   :  { %v904_v57 = vpop.f32.mrf.mxu1  ;;  %v916_v6 = vadd.f32 %v915_v29, %v903_v3  ;;  %v1267_v55 = vmul.u32 2654435769, %v1265_v32  ;;  %v1268_v29 = vstv %s1266_s6 }
  0xf6   :  { %v1269_v57 = vadd.s32 %v1268_v29, %v1267_v55 }
  0xf8   :  { %v928_v60 = vpop.f32.mrf.mxu3  ;;  %v1270_v58 = vshrl.u32 %v1269_v57, 16 }
  0xf9   :  { %v929_v8 = vadd.f32 %v928_v60, %v916_v6 }
  0xfa   :  { %v1271_v60 = vxor.u32 %v1270_v58, %v1269_v57 }
  0xfb   :  { %v917_v62 = vpop.f32.mrf.mxu2 }
  0xfc   :  { %v1272_v61 = vmul.u32 2146121005, %v1271_v60 }
  0xfe   :  { %v1273_v51 = vshrl.u32 %v1272_v61, 15 }
 0x100   :  { %v930_v4 = vpop.f32.mrf.mxu3  ;;  %v1274_v62 = vxor.u32 %v1273_v51, %v1272_v61 }
 0x101   :  { %v2086_v4 = vld [vmem:[%s2362_s7] ss:$0 sm:$0xff]  ;;  %s2176_s7 = smov [#allocation9]  }
 0x102   :  { %v1275_v53 = vmul.u32 2221713035, %v1274_v62 }
 0x104   :  { %v1276_v63 = vshrl.u32 %v1275_v53, 16 }
 0x106   :  { %v1277_v3 = vxor.u32 %v1276_v63, %v1275_v53 }
 0x108   :  { %v1278_v6 = vshrl.u32 %v1277_v3, 1 }
 0x10a   :  { %vm1279_vm6 = vcmp.ge.s32.totalorder %v1278_v6, 429496729 }
 0x10b   :  { %v941_v9 = vpop.f32.mrf.mxu0 }
 0x10c   :  { %v942_v10 = vadd.f32 %v941_v9, %v929_v8  ;;  %v954_v11 = vpop.f32.mrf.mxu1 }
 0x10e   :  { %v955_v12 = vadd.f32 %v954_v11, %v942_v10 }
 0x110   :  { %v959_v14 = vmax.f32 %v955_v12, 0.0  ;;  %v2087_v12 = vld [vmem:[%s2364_s9] ss:$0 sm:$0xff]  ;;  %s1355_s9 = sshll.u32 %s2176_s7, 4  ;;  %s1356_s9 = int_to_ptr.vmem [resolvable:$true] %s1355_s9 }
 0x112   :  { %v999_v15 = vmul.f32 1.25, %v959_v14 }
 0x113   :  { %v943_v16 = vpop.f32.mrf.mxu0 }
 0x114   :  { %v1884_v17 = vpack.c.bf16 %v999_v15, %v999_v15  ;;  %v956_v18 = vpop.f32.mrf.mxu1 }
 0x116   :  { %1885 = vmatmul.msk.bf16.vlgmr.msrb.gmra.mxu3 %vm1883_vm3, %v1884_v17 }
 0x15f   :  { %v1145_v24 = vpop.f32.mrf.mxu2 }
 0x160   :  { %v1146_v43 = vadd.f32 %v2085_v41, %v1145_v24 }
 0x167   :  { %v1147_v54 = vpop.f32.mrf.mxu2 }
 0x199   :  { %v1158_v45 = vpop.f32.mrf.mxu3 }
 0x19a   :  { %v1159_v46 = vadd.f32 %v1158_v45, %v1146_v43 }
 0x19c   :  { %v1162_v47 = vmax.f32 %v1159_v46, 0.0 }
 0x19e   :  { %v1179_v48 = vmul.f32 1.25, %v1162_v47 }
 0x1a0   :  { %v1919_v49 = vpack.c.bf16 %v1179_v48, %v1179_v48 }
 0x1a1   :  { %v1160_v50 = vpop.f32.mrf.mxu3 }
 0x1a2   :  { %1920 = vmatmul.msk.bf16.vlgmr.msra.gmra.mxu0 %vm1918_vm5, %v1919_v49 }
 0x21f   :  { %v1259_v5 = vpop.f32.mrf.mxu0 }
 0x220   :  { %v1260_v7 = vadd.f32 %v2086_v4, %v1259_v5 }
 0x222   :  { %v1263_v8 = vmax.f32 %v1260_v7, 0.0 }
 0x224   :  { %v1280_v9 = vmul.f32 1.25, %v1263_v8 }
 0x226   :  { %v1281_v10 = vsel %vm1279_vm6, %v1280_v9, 0.0 }
 0x227   :  { %v1282_v11 = vpack.c.bf16 %v1281_v10, %v1281_v10  ;;  %v1261_v0 = vpop.f32.mrf.mxu0 }
 0x229   :  { %1937 = vmatmul.msk.bf16.vlgmr.msra.gmra.mxu1 %vm1319_vm7, %v1282_v11 }
 0x2a6   :  { %v1332_v14 = vpop.f32.mrf.mxu1 }
 0x2a7   :  { %v1333_v15 = vadd.f32 %v2087_v12, %v1332_v14 }
 0x2a9   :  { %v1337_v16 = vsel %vm1336_vm8, %v1333_v15, -inf }
 0x2aa   :  { %1338 = vmax.xlane.f32.xlu0 %v1337_v16 }
 0x2ae   :  { %v1334_v17 = vpop.f32.mrf.mxu1 }
 0x31d   :  { %v1339_v18 = vpop.xlane.xlu0 %1338 }
 0x31e   :  { %v1340_v19 = vsub.f32 %v1333_v15, %v1339_v18 }
 0x320   :  { %v1341_v20 = vmul.f32 1.442695, %v1340_v19 }
 0x322   :  { %2088 = vpow2.f32 %v1341_v20 }
 0x328   :  { %v2089_v21 = vpop.eup %2088 }
 0x329   :  { %v1343_v22 = vsel %vm1336_vm8, %v2089_v21, 0.0 }
 0x32a   :  { %1344 = vadd.xlane.f32.xlu0 %v1343_v22 }
 0x39d   :  { %v1345_v2 = vpop.xlane.xlu0 %1344 }
 0x39e   :  { %2090 = vlog2.f32 %v1345_v2 }
 0x3a4   :  { %v2091_v23 = vpop.eup %2090 }
 0x3a5   :  { %v1347_v24 = vmul.f32 0.6931472, %v2091_v23 }
 0x3a7   :  { %v1348_v1 = vsub.f32 %v1340_v19, %v1347_v24 }
 0x3a9   :  { %1349 = vst.msk [vmem:[#allocation9] sm:$0xff] %vm1336_vm8, %v1348_v1 }
 0x3aa   :  { %1360 = dma.vmem_to_hbm [thread:$0]  %s1356_s9, 128, %s1358_s23, [#allocation6]  }
 0x3ab   :  { %2168 = dma.done.wait [#allocation6], 128  }
 0x3ac   :  { %2169 = vsyncadd [#allocation6], 4294967168 }
 0x3ad   :  { %1365 = vsyncpa [#allocation5], 1 }
 0x3ae   :  { %1366 = vsyncpa [#allocation8], 1 }
 0x3af   :  { %1367 = vsyncpa [#allocation6], 1 }

</bundles_post_ra>
